<compile_context>
chip_gen: v5e
topology: v5e:2x2
jax: 0.10.0
libtpu: 0.0.40
codegen_flags: <defaults>
</compile_context>

<pallas_src>
import jax
import jax.numpy as jnp
from jax.experimental import pallas as pl
from jax.experimental.pallas import tpu as pltpu

IN_FEATURES = 500
NOISE_DIM = 128
CLASS_DIM = 1000
CLASS_PAD = 1024                    # lane-dense class width (multiple of 128)
FUSED_DIM = NOISE_DIM + CLASS_PAD   # 1152 = 9 * 128


def _input_transformer_kernel(x_ref, scale_ref, mean_ref, w_ref,
                              noise_ref, cls_ref):
    # Affine input transform in f32; scale/mean are (1, 500) broadcast over rows.
    xt = scale_ref[...] * x_ref[...] + mean_ref[...]

    # One fused MXU matmul: (tb, 500) @ (500, 1152) -> (tb, 1152), f32 accumulate.
    fused = jnp.dot(xt.astype(w_ref.dtype), w_ref[...],
                    preferred_element_type=jnp.float32)

    # First 128 lanes: noise head.
    noise_ref[...] = fused[:, :NOISE_DIM].astype(noise_ref.dtype)

    # Remaining 1024 lanes: padded class logits.  Mask the 24 zero-weight pad
    # columns to -inf so they don't pollute the softmax max / denominator.
    logits = fused[:, NOISE_DIM:]
    col = jax.lax.broadcasted_iota(jnp.int32, logits.shape, dimension=1)
    logits = jnp.where(col < CLASS_DIM, logits, -jnp.inf)

    # Numerically-stable softmax over the last axis, all in f32.
    m = jnp.max(logits, axis=-1, keepdims=True)
    e = jnp.exp(logits - m)
    denom = jnp.sum(e, axis=-1, keepdims=True)
    # Exact reciprocal keeps sum(softmax) == 1 to f32 rounding (~1e-6);
    # approx=True would be marginally cheaper but loosens that invariant.
    cls_ref[...] = (e * pl.reciprocal(denom, approx=False)).astype(cls_ref.dtype)


def input_transformer(x, variances, means, w_noise, w_class, *,
                      tb=256, weight_dtype=jnp.bfloat16):
    """x: (B, 500); variances/means: (1, 500);
    w_noise: (500, 128); w_class: (500, 1000) (both pre-transposed for x @ W).
    Returns (noise (B, 128), classes (B, 1000))."""
    B = x.shape[0]
    tb = min(tb, B)
    grid = (pl.cdiv(B, tb),)

    # Hoisted, tiny parameter prep (in a real model this happens once at load
    # time): scale = exp(var) + 1, and the fused/padded low-precision RHS.
    scale = jnp.exp(variances) + 1.0
    w_class_pad = jnp.pad(w_class, ((0, 0), (0, CLASS_PAD - CLASS_DIM)))
    w_fused = jnp.concatenate([w_noise, w_class_pad], axis=1).astype(weight_dtype)

    out_shapes = (
        jax.ShapeDtypeStruct((B, NOISE_DIM), jnp.float32),
        jax.ShapeDtypeStruct((B, CLASS_PAD), jnp.float32),
    )

    def row_spec(n):
        # Tiled over the batch grid (pipelined / double-buffered).
        return pl.BlockSpec((tb, n), lambda i: (i, 0))

    def resident_spec(shape):
        # Constant index_map -> fetched once, resident in VMEM across steps.
        return pl.BlockSpec(shape, lambda i: (0, 0))

    itemsize = jnp.dtype(weight_dtype).itemsize
    cost = pl.CostEstimate(
        flops=2 * B * IN_FEATURES * FUSED_DIM,
        transcendentals=B * CLASS_PAD,  # softmax exps
        bytes_accessed=(x.size * 4
                        + IN_FEATURES * FUSED_DIM * itemsize
                        + 2 * IN_FEATURES * 4
                        + B * (NOISE_DIM + CLASS_PAD) * 4),
    )

    noise, cls_padded = pl.pallas_call(
        _input_transformer_kernel,
        out_shape=out_shapes,
        grid=grid,
        in_specs=[
            row_spec(IN_FEATURES),                  # x: (tb, 500) per step
            resident_spec((1, IN_FEATURES)),        # scale (VMEM-resident)
            resident_spec((1, IN_FEATURES)),        # means (VMEM-resident)
            resident_spec((IN_FEATURES, FUSED_DIM)),  # fused bf16 weights (resident)
        ],
        out_specs=(row_spec(NOISE_DIM), row_spec(CLASS_PAD)),
        compiler_params=pltpu.CompilerParams(
            dimension_semantics=("parallel",)),     # v7x: batch axis over 2 TCs
        cost_estimate=cost,
    )(x, scale, means, w_fused)

    # Drop the 24 padded class columns (they are exactly zero after the mask).
    return noise, cls_padded[:, :CLASS_DIM]


# ----------------------------------------------------------------------------
# References for validation.
def _reference_f32(x, variances, means, w_noise, w_class):
    xt = (jnp.exp(variances) + 1.0) * x + means
    noise = xt @ w_noise
    logits = xt @ w_class
    return noise, jax.nn.softmax(logits, axis=1)


def _reference_bf16(x, variances, means, w_noise, w_class):
    # Same bf16 weight/activation quantization as the kernel (f32 accumulate),
    # used to check the kernel's logic tightly.
    xt = (jnp.exp(variances) + 1.0) * x + means
    xb = xt.astype(jnp.bfloat16)
    noise = jnp.dot(xb, w_noise.astype(jnp.bfloat16),
                    preferred_element_type=jnp.float32)
    logits = jnp.dot(xb, w_class.astype(jnp.bfloat16),
                     preferred_element_type=jnp.float32)
    return noise, jax.nn.softmax(logits, axis=1)


if __name__ == "__main__":
    key = jax.random.PRNGKey(0)
    k_x, k_var, k_mean, k_wn, k_wc = jax.random.split(key, 5)

    # Deterministic parameter init matching the module's shapes.
    variances = jax.random.normal(k_var, (1, IN_FEATURES), dtype=jnp.float32)
    means = jax.random.normal(k_mean, (1, IN_FEATURES), dtype=jnp.float32)
    lim = 1.0 / jnp.sqrt(IN_FEATURES)
    w_noise = jax.random.uniform(k_wn, (IN_FEATURES, NOISE_DIM),
                                 minval=-lim, maxval=lim, dtype=jnp.float32)
    w_class = jax.random.uniform(k_wc, (IN_FEATURES, CLASS_DIM),
                                 minval=-lim, maxval=lim, dtype=jnp.float32)

    # (B=2, single grid step) and (B=64, tb=16: 4 pipelined grid steps).
    for B, tb in ((2, 256), (64, 16)):
        kx = jax.random.fold_in(k_x, B)
        x = jax.random.normal(kx, (B, IN_FEATURES), dtype=jnp.float32)

        noise, classes = input_transformer(x, variances, means,
                                           w_noise, w_class, tb=tb)
        noise = jax.block_until_ready(noise)
        classes = jax.block_until_ready(classes)

        assert noise.shape == (B, NOISE_DIM)
        assert classes.shape == (B, CLASS_DIM)

        # Tight check against a reference using the same bf16 quantization.
        rn_b, rc_b = _reference_bf16(x, variances, means, w_noise, w_class)
        assert jnp.allclose(noise, rn_b, atol=5e-3, rtol=5e-3)
        assert jnp.allclose(classes, rc_b, atol=1e-3, rtol=1e-2)

        # Fidelity check against the pure-f32 module semantics (bf16 weight
        # quantization noise only).
        rn_f, rc_f = _reference_f32(x, variances, means, w_noise, w_class)
        assert jnp.allclose(noise, rn_f, atol=1e-1, rtol=5e-2)
        assert jnp.allclose(classes, rc_f, atol=2e-2)

        # Softmax rows sum to 1 (exact reciprocal keeps this tight).
        assert jnp.allclose(jnp.sum(classes, axis=1), 1.0, atol=1e-5)

    print("KERNEL_OK")
</pallas_src>

<mosaic_0001>
module attributes {stable_mosaic.version = 11 : i64} {
  func.func @_input_transformer_kernel(%arg0: i32, %arg1: memref<2x500xf32, #tpu.memory_space<vmem>>, %arg2: memref<1x500xf32, #tpu.memory_space<vmem>>, %arg3: memref<1x500xf32, #tpu.memory_space<vmem>>, %arg4: memref<500x1152xbf16, #tpu.memory_space<vmem>>, %arg5: memref<2x128xf32, #tpu.memory_space<vmem>>, %arg6: memref<2x1024xf32, #tpu.memory_space<vmem>>) attributes {dimension_semantics = [#tpu.dimension_semantics<parallel>], iteration_bounds = array<i64: 1>, scalar_prefetch = 0 : i64, scratch_operands = 0 : i64, tpu.core_type = #tpu.core_type<tc>, window_params = [{transform_indices = @transform_0, window_bounds = array<i64: 2, 500>}, {pipeline_mode = #tpu.pipeline_mode<synchronous>, transform_indices = @transform_1, window_bounds = array<i64: 1, 500>}, {pipeline_mode = #tpu.pipeline_mode<synchronous>, transform_indices = @transform_2, window_bounds = array<i64: 1, 500>}, {pipeline_mode = #tpu.pipeline_mode<synchronous>, transform_indices = @transform_3, window_bounds = array<i64: 500, 1152>}, {transform_indices = @transform_4, window_bounds = array<i64: 2, 128>}, {transform_indices = @transform_5, window_bounds = array<i64: 2, 1024>}]} {
    %c0 = arith.constant 0 : index
    %c0_0 = arith.constant 0 : index
    %0 = vector.load %arg2[%c0, %c0_0] : memref<1x500xf32, #tpu.memory_space<vmem>>, vector<1x500xf32>
    %c0_1 = arith.constant 0 : index
    %c0_2 = arith.constant 0 : index
    %1 = vector.load %arg1[%c0_1, %c0_2] : memref<2x500xf32, #tpu.memory_space<vmem>>, vector<2x500xf32>
    %2 = vector.broadcast %0 : vector<1x500xf32> to vector<2x500xf32>
    %3 = arith.mulf %2, %1 : vector<2x500xf32>
    %c0_3 = arith.constant 0 : index
    %c0_4 = arith.constant 0 : index
    %4 = vector.load %arg3[%c0_3, %c0_4] : memref<1x500xf32, #tpu.memory_space<vmem>>, vector<1x500xf32>
    %5 = vector.broadcast %4 : vector<1x500xf32> to vector<2x500xf32>
    %6 = arith.addf %3, %5 : vector<2x500xf32>
    %7 = arith.truncf %6 : vector<2x500xf32> to vector<2x500xbf16>
    %c0_5 = arith.constant 0 : index
    %c0_6 = arith.constant 0 : index
    %8 = vector.load %arg4[%c0_5, %c0_6] : memref<500x1152xbf16, #tpu.memory_space<vmem>>, vector<500x1152xbf16>
    %cst = arith.constant dense<0.000000e+00> : vector<2x1152xf32>
    %9 = tpu.matmul %7, %8, %cst {dimension_numbers = #tpu.dot_dimension_numbers<[1], [0], [0], [1], [0, 0, 1, 1], [], []>} : vector<2x500xbf16>, vector<500x1152xbf16>, vector<2x1152xf32> -> vector<2x1152xf32>
    %10 = vector.extract_strided_slice %9 {offsets = [0, 0], sizes = [2, 128], strides = [1, 1]} : vector<2x1152xf32> to vector<2x128xf32>
    %c0_7 = arith.constant 0 : index
    %c0_8 = arith.constant 0 : index
    %11 = vector.load %arg5[%c0_7, %c0_8] : memref<2x128xf32, #tpu.memory_space<vmem>>, vector<2x128xf32>
    tpu.vector_store %arg5[%c0_7, %c0_8], %10 {strides = array<i32>} : memref<2x128xf32, #tpu.memory_space<vmem>>, vector<2x128xf32>,
    %12 = vector.extract_strided_slice %9 {offsets = [0, 128], sizes = [2, 1024], strides = [1, 1]} : vector<2x1152xf32> to vector<2x1024xf32>
    %13 = tpu.iota {dimensions = array<i32: 1>} : vector<2x1024xi32>
    %c1000_i32 = arith.constant 1000 : i32
    %14 = vector.broadcast %c1000_i32 : i32 to vector<2x1024xi32>
    %15 = arith.cmpi slt, %13, %14 : vector<2x1024xi32>
    %cst_9 = arith.constant 0xFF800000 : f32
    %16 = vector.broadcast %cst_9 : f32 to vector<2x1024xf32>
    %17 = arith.select %15, %12, %16 : vector<2x1024xi1>, vector<2x1024xf32>
    %cst_10 = arith.constant dense<0xFF800000> : vector<2xf32>
    %18 = vector.multi_reduction <maximumf>, %17, %cst_10 [1] : vector<2x1024xf32> to vector<2xf32>
    %19 = vector.shape_cast %18 : vector<2xf32> to vector<2x1xf32>
    %20 = vector.broadcast %19 : vector<2x1xf32> to vector<2x1024xf32>
    %21 = arith.subf %17, %20 : vector<2x1024xf32>
    %22 = math.exp %21 : vector<2x1024xf32>
    %cst_11 = arith.constant dense<0.000000e+00> : vector<2xf32>
    %23 = vector.multi_reduction <add>, %22, %cst_11 [1] : vector<2x1024xf32> to vector<2xf32>
    %24 = vector.shape_cast %23 : vector<2xf32> to vector<2x1xf32>
    %25 = tpu.reciprocal %24 : vector<2x1xf32> -> vector<2x1xf32>
    %26 = vector.broadcast %25 : vector<2x1xf32> to vector<2x1024xf32>
    %27 = arith.mulf %22, %26 : vector<2x1024xf32>
    %c0_12 = arith.constant 0 : index
    %c0_13 = arith.constant 0 : index
    %28 = vector.load %arg6[%c0_12, %c0_13] : memref<2x1024xf32, #tpu.memory_space<vmem>>, vector<2x1024xf32>
    tpu.vector_store %arg6[%c0_12, %c0_13], %27 {strides = array<i32>} : memref<2x1024xf32, #tpu.memory_space<vmem>>, vector<2x1024xf32>,
    return
  }
  func.func @transform_0(%arg0: i32) -> (i32, i32) {
    %c0_i32 = arith.constant 0 : i32
    %c0_i32_0 = arith.constant 0 : i32
    return %arg0, %c0_i32 : i32, i32
  }
  func.func @transform_1(%arg0: i32) -> (i32, i32) {
    %c0_i32 = arith.constant 0 : i32
    %c0_i32_0 = arith.constant 0 : i32
    %c0_i32_1 = arith.constant 0 : i32
    return %c0_i32, %c0_i32_0 : i32, i32
  }
  func.func @transform_2(%arg0: i32) -> (i32, i32) {
    %c0_i32 = arith.constant 0 : i32
    %c0_i32_0 = arith.constant 0 : i32
    %c0_i32_1 = arith.constant 0 : i32
    return %c0_i32, %c0_i32_0 : i32, i32
  }
  func.func @transform_3(%arg0: i32) -> (i32, i32) {
    %c0_i32 = arith.constant 0 : i32
    %c0_i32_0 = arith.constant 0 : i32
    %c0_i32_1 = arith.constant 0 : i32
    return %c0_i32, %c0_i32_0 : i32, i32
  }
  func.func @transform_4(%arg0: i32) -> (i32, i32) {
    %c0_i32 = arith.constant 0 : i32
    %c0_i32_0 = arith.constant 0 : i32
    return %arg0, %c0_i32 : i32, i32
  }
  func.func @transform_5(%arg0: i32) -> (i32, i32) {
    %c0_i32 = arith.constant 0 : i32
    %c0_i32_0 = arith.constant 0 : i32
    return %arg0, %c0_i32 : i32, i32
  }
}

</mosaic_0001>

<bundles_post_ra>
// kernel: tpu_custom_call.1
= control target key start
LH: loop header
LB: loop body
LE: loop exit
PB: predicated region body
PF: predicated region fallthrough
CT: control target
= control target key end

     0   :  { %11 = vsyncpa [#allocation3], 0  ;;  %s4312_s0 = inlined_call_operand.hbm [shape: f32[2,500], index: 0, kind: input, shape index: {}]   ;;  %s4313_s1 = inlined_call_operand.hbm [shape: f32[1,500], index: 1, kind: input, shape index: {}]   ;;  %s4314_s2 = inlined_call_operand.hbm [shape: f32[1,500], index: 2, kind: input, shape index: {}]   ;;  %s4315_s3 = inlined_call_operand.hbm [shape: bf16[500,1152], index: 3, kind: input, shape index: {}]   ;;  %s4316_s4 = inlined_call_operand.hbm [shape: f32[2,128], index: 4, kind: output, shape index: {0}]   ;;  %s4317_s5 = inlined_call_operand.hbm [shape: f32[2,1024], index: 5, kind: output, shape index: {1}]  }
   0x1   :  { %12 = vsyncpa [#allocation6], 0 }
   0x2   :  { %13 = vsyncpa [#allocation9], 0 }
   0x3   :  { %14 = vsyncpa [#allocation4], 0  ;;  %s32_s20 = sshll.u32 %s4313_s1, 4  ;;  %s33_s20 = int_to_ptr.hbm [resolvable:$true] %s32_s20 }
   0x4   :  { %15 = vsyncpa [#allocation12], 0  ;;  %s4136_s21 = smov [#allocation5]   ;;  %s21_s25 = sshll.u32 %s4312_s0, 4  ;;  %s22_s25 = int_to_ptr.hbm [resolvable:$true] %s21_s25 }
   0x5   :  { %s34_s22 = sshll.u32 %s4136_s21, 4  ;;  %s4137_s26 = smov [#allocation2]   ;;  %s35_s22 = int_to_ptr.vmem [resolvable:$true] %s34_s22 }
   0x6   :  { %37 = dma.hbm_to_vmem [thread:$0]  %s33_s20, 64, %s35_s22, [#allocation6]  }
   0x7   :  { %s23_s27 = sshll.u32 %s4137_s26, 4  ;;  %s43_s30 = sshll.u32 %s4314_s2, 4  ;;  %s24_s27 = int_to_ptr.vmem [resolvable:$true] %s23_s27  ;;  %s44_s30 = int_to_ptr.hbm [resolvable:$true] %s43_s30 }
   0x8   :  { %26 = dma.hbm_to_vmem [thread:$0]  %s22_s25, 128, %s24_s27, [#allocation3]  }
   0x9   :  { %s53_s7 = sshll.u32 %s4315_s3, 4  ;;  %s4138_s8 = smov [#allocation7]   ;;  %s54_s7 = int_to_ptr.hbm [resolvable:$true] %s53_s7 }
   0xa   :  { %s45_s9 = sshll.u32 %s4138_s8, 4  ;;  %s4139_s0 = smov [#allocation8]   ;;  %s46_s9 = int_to_ptr.vmem [resolvable:$true] %s45_s9 }
   0xb   :  { %48 = dma.hbm_to_vmem [thread:$0]  %s44_s30, 64, %s46_s9, [#allocation6]  }
   0xc   :  { %s55_s10 = sshll.u32 %s4139_s0, 4  ;;  %s4140_s11 = smov 576   ;;  %s56_s10 = int_to_ptr.vmem [resolvable:$true] %s55_s10 }
   0xd   :  { %s4141_s12 = smov 36  }
   0xe   :  { %61 = dma.hbm_to_vmem [thread:$0]  %s54_s7, 36288, %s56_s10, [#allocation9], %s4140_s11, %s4140_s11, %s4141_s12  }
   0xf   :  { %4126 = dma.done.wait [#allocation3], 128  }
  0x10   :  { %4127 = vsyncadd [#allocation3], 4294967168 }
  0x11   :  { %4128 = dma.done.wait [#allocation6], 128  }
  0x12   :  { %4129 = vsyncadd [#allocation6], 4294967168 }
  0x13   :  { %4130 = dma.done.wait [#allocation9], 36288  }
  0x14   :  { %4131 = vsyncadd [#allocation9], 4294931008  ;;  %vm1889_vm0 = vcmask 1041408   ;;  %v2806_v0 = vld [vmem:[#allocation8 + $0x1f8] sm:$0xf]  ;;  %vm1885_vm1 = vcmask 949248  }
  0x15   :  { %v3744_v1 = vld [vmem:[#allocation8 + $0x218] sm:$0xf0]  ;;  %v3094_v2 = vld [vmem:[#allocation8 + $0x438] sm:$0xf]  ;;  %v2770_v10 = vld [vmem:[#allocation8 + $0x1b0] sm:$0xf] }
  0x16   :  { %v2807_v3 = vor.u32 %v3744_v1, %v2806_v0  ;;  %v3816_v4 = vld [vmem:[#allocation8 + $0x458] sm:$0xf0]  ;;  %v3382_v5 = vld [vmem:[#allocation8 + $0x678] sm:$0xf]  ;;  %v3735_v11 = vld [vmem:[#allocation8 + $0x1d0] sm:$0xf0] }
  0x17   :  { %v3888_v6 = vld [vmem:[#allocation8 + $0x698] sm:$0xf0]  ;;  %v3095_v7 = vor.u32 %v3816_v4, %v3094_v2  ;;  %v2771_v13 = vor.u32 %v3735_v11, %v2770_v10  ;;  %v3058_v14 = vld [vmem:[#allocation8 + $0x3f0] sm:$0xf]  ;;  %v3807_v15 = vld [vmem:[#allocation8 + $0x410] sm:$0xf0] }
  0x18   :  { %v3383_v8 = vor.u32 %v3888_v6, %v3382_v5  ;;  %v4186_v9 = vld [vmem:[#allocation8 + $0x8b8] sm:$0x33]  ;;  %1917 = vmatpush.bf16.msra.mxu0 %v2807_v3  ;;  %v3346_v16 = vld [vmem:[#allocation8 + $0x630] sm:$0xf]  ;;  %v3059_v17 = vor.u32 %v3807_v15, %v3058_v14  ;;  %v3879_v18 = vld [vmem:[#allocation8 + $0x650] sm:$0xf0] }
  0x19   :  { %v1309_v12 = vunpack.c.l.b16 %v4186_v9  ;;  %1930 = vmatpush.bf16.msra.mxu1 %v3095_v7  ;;  %v3634_v19 = vld [vmem:[#allocation8 + $0x870] sm:$0xf]  ;;  %v3951_v20 = vld [vmem:[#allocation8 + $0x890] sm:$0xf0]  ;;  %v3347_v22 = vor.u32 %v3879_v18, %v3346_v16  ;;  %v2734_v23 = vld [vmem:[#allocation8 + $0x168] sm:$0xf] }
  0x1a   :  { %1943 = vmatpush.bf16.msra.mxu2 %v3383_v8  ;;  %v3726_v24 = vld [vmem:[#allocation8 + $0x188] sm:$0xf0]  ;;  %v3022_v25 = vld [vmem:[#allocation8 + $0x3a8] sm:$0xf]  ;;  %v3635_v31 = vor.u32 %v3951_v20, %v3634_v19  ;;  %v2698_v34 = vld [vmem:[#allocation8 + $0x120] sm:$0xf] }
  0x1b   :  { %v1597_v21 = vpack.c.b16 %v1309_v12, %v1309_v12  ;;  %v3798_v26 = vld [vmem:[#allocation8 + $0x3c8] sm:$0xf0]  ;;  %v3310_v27 = vld [vmem:[#allocation8 + $0x5e8] sm:$0xf]  ;;  %v2735_v30 = vor.u32 %v3726_v24, %v2734_v23  ;;  %v3717_v35 = vld [vmem:[#allocation8 + $0x140] sm:$0xf0] }
  0x1c   :  { %v3870_v28 = vld [vmem:[#allocation8 + $0x608] sm:$0xf0]  ;;  %1918 = vmatpush.bf16.msra.mxu0 %v2771_v13  ;;  %v3023_v32 = vor.u32 %v3798_v26, %v3022_v25  ;;  %v3598_v33 = vld [vmem:[#allocation8 + $0x828] sm:$0xf]  ;;  %v2986_v38 = vld [vmem:[#allocation8 + $0x360] sm:$0xf]  ;;  %v2699_v42 = vor.u32 %v3717_v35, %v2698_v34 }
  0x1d   :  { %v1891_v29 = vsel %vm1889_vm0, %v1597_v21, 0  ;;  %1931 = vmatpush.bf16.msra.mxu1 %v3059_v17  ;;  %v3311_v36 = vor.u32 %v3870_v28, %v3310_v27  ;;  %v3942_v37 = vld [vmem:[#allocation8 + $0x848] sm:$0xf0]  ;;  %v3789_v39 = vld [vmem:[#allocation8 + $0x380] sm:$0xf0]  ;;  %v1310_v27 = vunpack.c.h.b16 %v4186_v9  ;;  %s2524_s13 = sshll.u32 %s4316_s4, 4  ;;  %s2525_s13 = int_to_ptr.hbm [resolvable:$true] %s2524_s13 }
  0x1e   :  { %1956 = vmatpush.bf16.msra.mxu3 %v1891_v29  ;;  %1944 = vmatpush.bf16.msra.mxu2 %v3347_v22  ;;  %v3274_v40 = vld [vmem:[#allocation8 + $0x5a0] sm:$0xf]  ;;  %v3861_v41 = vld [vmem:[#allocation8 + $0x5c0] sm:$0xf0]  ;;  %v3599_v43 = vor.u32 %v3942_v37, %v3598_v33  ;;  %v2987_v44 = vor.u32 %v3789_v39, %v2986_v38  ;;  %v2662_v46 = vld [vmem:[#allocation8 + $0xd8] sm:$0xf] }
  0x1f   :  { %v3562_v45 = vld [vmem:[#allocation8 + $0x7e0] sm:$0xf]  ;;  %v3708_v47 = vld [vmem:[#allocation8 + $0xf8] sm:$0xf0]  ;;  %v3275_v48 = vor.u32 %v3861_v41, %v3274_v40  ;;  %v3933_v49 = vld [vmem:[#allocation8 + $0x800] sm:$0xf0]  ;;  %v1598_v41 = vpack.c.b16 %v1310_v27, %v1310_v27 }
  0x20   :  { %1919 = vmatpush.bf16.msra.mxu0 %v2735_v30  ;;  %v2950_v50 = vld [vmem:[#allocation8 + $0x318] sm:$0xf]  ;;  %v3780_v51 = vld [vmem:[#allocation8 + $0x338] sm:$0xf0]  ;;  %v2663_v54 = vor.u32 %v3708_v47, %v2662_v46  ;;  %v3563_v55 = vor.u32 %v3933_v49, %v3562_v45  ;;  %v2626_v58 = vld [vmem:[#allocation8 + $0x90] sm:$0xf] }
  0x21   :  { %1932 = vmatpush.bf16.msra.mxu1 %v3023_v32  ;;  %v3238_v52 = vld [vmem:[#allocation8 + $0x558] sm:$0xf]  ;;  %v3852_v53 = vld [vmem:[#allocation8 + $0x578] sm:$0xf0]  ;;  %v2951_v56 = vor.u32 %v3780_v51, %v2950_v50  ;;  %v3699_v59 = vld [vmem:[#allocation8 + $0xb0] sm:$0xf0] }
  0x22   :  { %1957 = vmatpush.bf16.msra.mxu3 %v3635_v31  ;;  %1945 = vmatpush.bf16.msra.mxu2 %v3311_v36  ;;  %v3526_v57 = vld [vmem:[#allocation8 + $0x798] sm:$0xf]  ;;  %v3239_v60 = vor.u32 %v3852_v53, %v3238_v52  ;;  %v3924_v61 = vld [vmem:[#allocation8 + $0x7b8] sm:$0xf0]  ;;  %v2914_v62 = vld [vmem:[#allocation8 + $0x2d0] sm:$0xf]  ;;  %v2627_v2 = vor.u32 %v3699_v59, %v2626_v58 }
  0x23   :  { %v3771_v63 = vld [vmem:[#allocation8 + $0x2f0] sm:$0xf0]  ;;  %v3202_v0 = vld [vmem:[#allocation8 + $0x510] sm:$0xf]  ;;  %v3527_v3 = vor.u32 %v3924_v61, %v3526_v57  ;;  %v2590_v6 = vld [vmem:[#allocation8 + $0x48] sm:$0xf] }
  0x24   :  { %1920 = vmatpush.bf16.msra.mxu0 %v2699_v42  ;;  %v3843_v1 = vld [vmem:[#allocation8 + $0x530] sm:$0xf0]  ;;  %v2915_v4 = vor.u32 %v3771_v63, %v2914_v62  ;;  %v3490_v5 = vld [vmem:[#allocation8 + $0x750] sm:$0xf]  ;;  %v3690_v7 = vld [vmem:[#allocation8 + $0x68] sm:$0xf0] }
  0x25   :  { %1933 = vmatpush.bf16.msra.mxu1 %v2987_v44  ;;  %v3203_v8 = vor.u32 %v3843_v1, %v3202_v0  ;;  %v3915_v10 = vld [vmem:[#allocation8 + $0x770] sm:$0xf0]  ;;  %v2878_v11 = vld [vmem:[#allocation8 + $0x288] sm:$0xf]  ;;  %v3762_v12 = vld [vmem:[#allocation8 + $0x2a8] sm:$0xf0]  ;;  %v2591_v15 = vor.u32 %v3690_v7, %v2590_v6 }
  0x26   :  { %1958 = vmatpush.bf16.msra.mxu3 %v3599_v43  ;;  %1946 = vmatpush.bf16.msra.mxu2 %v3275_v48  ;;  %v3166_v13 = vld [vmem:[#allocation8 + $0x4c8] sm:$0xf]  ;;  %v3834_v14 = vld [vmem:[#allocation8 + $0x4e8] sm:$0xf0]  ;;  %v3491_v18 = vor.u32 %v3915_v10, %v3490_v5  ;;  %v2879_v19 = vor.u32 %v3762_v12, %v2878_v11  ;;  %v2554_v20 = vld [vmem:[#allocation8] sm:$0xf] }
  0x27   :  { %v3454_v16 = vld [vmem:[#allocation8 + $0x708] sm:$0xf]  ;;  %v3906_v17 = vld [vmem:[#allocation8 + $0x728] sm:$0xf0]  ;;  %v3681_v21 = vld [vmem:[#allocation8 + $0x20] sm:$0xf0]  ;;  %v3167_v23 = vor.u32 %v3834_v14, %v3166_v13 }
  0x28   :  { %1921 = vmatpush.bf16.msra.mxu0 %v2663_v54  ;;  %v2842_v22 = vld [vmem:[#allocation8 + $0x240] sm:$0xf]  ;;  %v3753_v24 = vld [vmem:[#allocation8 + $0x260] sm:$0xf0]  ;;  %v3740_v28 = vld [vmem:[#allocation8 + $0x1fc] sm:$0xf]  ;;  %v2555_v31 = vor.u32 %v3681_v21, %v2554_v20  ;;  %v3455_v35 = vor.u32 %v3906_v17, %v3454_v16 }
  0x29   :  { %1934 = vmatpush.bf16.msra.mxu1 %v2951_v56  ;;  %v3130_v25 = vld [vmem:[#allocation8 + $0x480] sm:$0xf]  ;;  %v3825_v26 = vld [vmem:[#allocation8 + $0x4a0] sm:$0xf0]  ;;  %v3812_v30 = vld [vmem:[#allocation8 + $0x43c] sm:$0xf]  ;;  %v2843_v36 = vor.u32 %v3753_v24, %v2842_v22 }
  0x2a   :  { %1959 = vmatpush.bf16.msra.mxu3 %v3563_v55  ;;  %1947 = vmatpush.bf16.msra.mxu2 %v3239_v60  ;;  %v2808_v29 = vld [vmem:[#allocation8 + $0x21c] sm:$0xf0]  ;;  %v3884_v33 = vld [vmem:[#allocation8 + $0x67c] sm:$0xf]  ;;  %v3131_v37 = vor.u32 %v3825_v26, %v3130_v25  ;;  %v3897_v40 = vld [vmem:[#allocation8 + $0x6e0] sm:$0xf0] }
  0x2b   :  { %v3096_v32 = vld [vmem:[#allocation8 + $0x45c] sm:$0xf0]  ;;  %v2811_v38 = vor.u32 %v3740_v28, %v2808_v29  ;;  %v3731_v43 = vld [vmem:[#allocation8 + $0x1b4] sm:$0xf]  ;;  %v2772_v44 = vld [vmem:[#allocation8 + $0x1d4] sm:$0xf0] }
  0x2c   :  { %1922 = vmatpush.bf16.msra.mxu0 %v2627_v2  ;;  %v3384_v34 = vld [vmem:[#allocation8 + $0x69c] sm:$0xf0]  ;;  %v3099_v42 = vor.u32 %v3812_v30, %v3096_v32  ;;  %v3803_v45 = vld [vmem:[#allocation8 + $0x3f4] sm:$0xf]  ;;  %v3060_v46 = vld [vmem:[#allocation8 + $0x414] sm:$0xf0]  ;;  %v2775_v51 = vor.u32 %v3731_v43, %v2772_v44 }
  0x2d   :  { %1935 = vmatpush.bf16.msra.mxu1 %v2915_v4  ;;  %v3418_v39 = vld [vmem:[#allocation8 + $0x6c0] sm:$0xf]  ;;  %v3387_v9 = vor.u32 %v3884_v33, %v3384_v34  ;;  %v3875_v47 = vld [vmem:[#allocation8 + $0x634] sm:$0xf]  ;;  %v3348_v48 = vld [vmem:[#allocation8 + $0x654] sm:$0xf0]  ;;  %v3063_v54 = vor.u32 %v3803_v45, %v3060_v46 }
  0x2e   :  { %1960 = vmatpush.bf16.msra.mxu3 %v3527_v3  ;;  %1948 = vmatpush.bf16.msra.mxu2 %v3203_v8  ;;  %v3419_v49 = vor.u32 %v3897_v40, %v3418_v39  ;;  %v1894_v50 = vsel %vm1889_vm0, %v1598_v41, 0  ;;  %v3947_v52 = vld [vmem:[#allocation8 + $0x874] sm:$0xf]  ;;  %v3636_v53 = vld [vmem:[#allocation8 + $0x894] sm:$0xf0]  ;;  %v3351_v55 = vor.u32 %v3875_v47, %v3348_v48  ;;  %s4142_s14 = smov [#allocation10]  }
  0x2f   :  { %v3722_v56 = vld [vmem:[#allocation8 + $0x16c] sm:$0xf]  ;;  %v2736_v57 = vld [vmem:[#allocation8 + $0x18c] sm:$0xf0]  ;;  %v3713_v0 = vld [vmem:[#allocation8 + $0x124] sm:$0xf]  ;;  %v3639_v3 = vor.u32 %v3947_v52, %v3636_v53 }
  0x30   :  { %1923 = vmatpush.bf16.msra.mxu0 %v2591_v15  ;;  %v3794_v58 = vld [vmem:[#allocation8 + $0x3ac] sm:$0xf]  ;;  %v3024_v59 = vld [vmem:[#allocation8 + $0x3cc] sm:$0xf0]  ;;  %v2700_v1 = vld [vmem:[#allocation8 + $0x144] sm:$0xf0]  ;;  %v2739_v4 = vor.u32 %v3722_v56, %v2736_v57 }
  0x31   :  { %1936 = vmatpush.bf16.msra.mxu1 %v2879_v19  ;;  %v3866_v60 = vld [vmem:[#allocation8 + $0x5ec] sm:$0xf]  ;;  %v3312_v61 = vld [vmem:[#allocation8 + $0x60c] sm:$0xf0]  ;;  %v3785_v5 = vld [vmem:[#allocation8 + $0x364] sm:$0xf]  ;;  %v3027_v7 = vor.u32 %v3794_v58, %v3024_v59  ;;  %v2703_v21 = vor.u32 %v3713_v0, %v2700_v1 }
  0x32   :  { %1961 = vmatpush.bf16.msra.mxu3 %v3491_v18  ;;  %1949 = vmatpush.bf16.msra.mxu2 %v3167_v23  ;;  %v3938_v62 = vld [vmem:[#allocation8 + $0x82c] sm:$0xf]  ;;  %v3600_v63 = vld [vmem:[#allocation8 + $0x84c] sm:$0xf0]  ;;  %v2988_v6 = vld [vmem:[#allocation8 + $0x384] sm:$0xf0]  ;;  %v3315_v8 = vor.u32 %v3866_v60, %v3312_v61 }
  0x33   :  { %v79_v2 = vld [vmem:[#allocation2] sm:$0xff]  ;;  %v3857_v10 = vld [vmem:[#allocation8 + $0x5a4] sm:$0xf]  ;;  %v3276_v11 = vld [vmem:[#allocation8 + $0x5c4] sm:$0xf0]  ;;  %v3603_v20 = vor.u32 %v3938_v62, %v3600_v63  ;;  %v2991_v26 = vor.u32 %v3785_v5, %v2988_v6  ;;  %s2522_s15 = sshll.u32 %s4142_s14, 4  ;;  %s2523_s15 = int_to_ptr.vmem [resolvable:$true] %s2522_s15 }
  0x34   :  { %1924 = vmatpush.bf16.msra.mxu0 %v2555_v31  ;;  %90 = vst [vmem:[#allocation1] ss:$4 sm:$0xff] %v79_v2  ;;  %v78_v12 = vld [vmem:[#allocation5] sm:$0xf]  ;;  %v3929_v13 = vld [vmem:[#allocation8 + $0x7e4] sm:$0xf]  ;;  %v3279_v27 = vor.u32 %v3857_v10, %v3276_v11 }
  0x35   :  { %1937 = vmatpush.bf16.msra.mxu1 %v2843_v36  ;;  %v3564_v14 = vld [vmem:[#allocation8 + $0x804] sm:$0xf0]  ;;  %v3704_v15 = vld [vmem:[#allocation8 + $0xdc] sm:$0xf]  ;;  %v2664_v16 = vld [vmem:[#allocation8 + $0xfc] sm:$0xf0] }
  0x36   :  { %1962 = vmatpush.bf16.msra.mxu3 %v3455_v35  ;;  %1950 = vmatpush.bf16.msra.mxu2 %v3131_v37  ;;  %v3776_v17 = vld [vmem:[#allocation8 + $0x31c] sm:$0xf]  ;;  %v2952_v18 = vld [vmem:[#allocation8 + $0x33c] sm:$0xf0]  ;;  %v83_v24 = vperm.slane %v78_v12, 2  ;;  %v84_v25 = vperm.slane %v78_v12, 3  ;;  %v2667_v39 = vor.u32 %v3704_v15, %v2664_v16 }
  0x37   :  { %v103_v19 = vld [vmem:[#allocation7] sm:$0xf]  ;;  %v3240_v23 = vld [vmem:[#allocation8 + $0x57c] sm:$0xf0]  ;;  %v81_v30 = vperm.slane %v78_v12, 0  ;;  %v82_v31 = vperm.slane %v78_v12, 1 }
  0x38   :  { %1969 = vmatpush.bf16.msrb.mxu0 %v2811_v38  ;;  %v3848_v22 = vld [vmem:[#allocation8 + $0x55c] sm:$0xf]  ;;  %v3528_v29 = vld [vmem:[#allocation8 + $0x7bc] sm:$0xf0]  ;;  %v3695_v32 = vld [vmem:[#allocation8 + $0x94] sm:$0xf]  ;;  %v3567_v38 = vor.u32 %v3929_v13, %v3564_v14 }
  0x39   :  { %1982 = vmatpush.bf16.msrb.mxu1 %v3099_v42  ;;  %v3920_v28 = vld [vmem:[#allocation8 + $0x79c] sm:$0xf]  ;;  %v2628_v33 = vld [vmem:[#allocation8 + $0xb4] sm:$0xf0]  ;;  %v107_v34 = vperm.slane %v103_v19, 2  ;;  %v108_v35 = vperm.slane %v103_v19, 3  ;;  %v2955_v42 = vor.u32 %v3776_v17, %v2952_v18  ;;  %v3243_v46 = vor.u32 %v3848_v22, %v3240_v23 }
  0x3a   :  { %1995 = vmatpush.bf16.msrb.mxu2 %v3387_v9  ;;  %1963 = vmatpush.bf16.msra.mxu3 %v3419_v49  ;;  %v105_v36 = vperm.slane %v103_v19, 0  ;;  %v106_v37 = vperm.slane %v103_v19, 1  ;;  %v3767_v47 = vld [vmem:[#allocation8 + $0x2d4] sm:$0xf]  ;;  %v2916_v48 = vld [vmem:[#allocation8 + $0x2f4] sm:$0xf0]  ;;  %v2631_v56 = vor.u32 %v3695_v32, %v2628_v33 }
  0x3b   :  { %v93_v40 = vld.sshfl [vmem:[#allocation1 + $0x10] sm:$0xff pattern:$0x73625140]  ;;  %v94_v41 = vld.sshfl [vmem:[#allocation1 + $0x18] sm:$0xff pattern:$0x73625140]  ;;  %v2919_v59 = vor.u32 %v3767_v47, %v2916_v48 }
  0x3c   :  { %1970 = vmatpush.bf16.msrb.mxu0 %v2775_v51  ;;  %v101_v9 = vmul.f32 %v93_v40, %v83_v24  ;;  %v102_v43 = vmul.f32 %v94_v41, %v84_v25  ;;  %v91_v44 = vld.sshfl [vmem:[#allocation1] sm:$0xff pattern:$0x73625140]  ;;  %v92_v45 = vld.sshfl [vmem:[#allocation1 + $0x8] sm:$0xff pattern:$0x73625140]  ;;  %v3531_v51 = vor.u32 %v3920_v28, %v3528_v29 }
  0x3d   :  { %1983 = vmatpush.bf16.msrb.mxu1 %v3063_v54  ;;  %v99_v49 = vmul.f32 %v91_v44, %v81_v30  ;;  %v3839_v52 = vld [vmem:[#allocation8 + $0x514] sm:$0xf]  ;;  %v3204_v53 = vld [vmem:[#allocation8 + $0x534] sm:$0xf0]  ;;  %v3686_v1 = vld [vmem:[#allocation8 + $0x4c] sm:$0xf] }
  0x3e   :  { %2008 = vmatpush.bf16.msrb.mxu3 %v1894_v50  ;;  %1996 = vmatpush.bf16.msrb.mxu2 %v3351_v55  ;;  %v100_v50 = vmul.f32 %v92_v45, %v82_v31  ;;  %v115_v54 = vadd.f32 %v107_v34, %v101_v9  ;;  %v116_v55 = vadd.f32 %v108_v35, %v102_v43  ;;  %v3911_v61 = vld [vmem:[#allocation8 + $0x754] sm:$0xf]  ;;  %v3492_v62 = vld [vmem:[#allocation8 + $0x774] sm:$0xf0]  ;;  %v2592_v2 = vld [vmem:[#allocation8 + $0x6c] sm:$0xf0] }
  0x3f   :  { %v113_v57 = vadd.f32 %v105_v36, %v99_v49  ;;  %v3207_v0 = vor.u32 %v3839_v52, %v3204_v53  ;;  %v2880_v6 = vld [vmem:[#allocation8 + $0x2ac] sm:$0xf0]  ;;  %v4205_v10 = vld [vmem:[#allocation8 + $0x8c0] sm:$0x33]  ;;  %v3495_v11 = vor.u32 %v3911_v61, %v3492_v62  ;;  %v2595_v12 = vor.u32 %v3686_v1, %v2592_v2  ;;  %v3902_v13 = vld [vmem:[#allocation8 + $0x70c] sm:$0xf] }
  0x40   :  { %1971 = vmatpush.bf16.msrb.mxu0 %v2739_v4  ;;  %v114_v58 = vadd.f32 %v106_v37, %v100_v50  ;;  %v4192_v60 = vpack.c.bf16 %v115_v54, %v115_v54  ;;  %v4194_v63 = vpack.c.bf16 %v116_v55, %v116_v55  ;;  %v3456_v14 = vld [vmem:[#allocation8 + $0x72c] sm:$0xf0]  ;;  %v3677_v15 = vld [vmem:[#allocation8 + $0x4] sm:$0xf]  ;;  %v2556_v18 = vld [vmem:[#allocation8 + $0x24] sm:$0xf0]  ;;  %v1311_v24 = vunpack.c.l.b16 %v4205_v10 }
  0x41   :  { %1984 = vmatpush.bf16.msrb.mxu1 %v3027_v7  ;;  %v4196_v4 = vpack.c.bf16 %v113_v57, %v113_v57  ;;  %v3830_v7 = vld [vmem:[#allocation8 + $0x4cc] sm:$0xf]  ;;  %v3749_v19 = vld [vmem:[#allocation8 + $0x244] sm:$0xf]  ;;  %v3132_v22 = vld [vmem:[#allocation8 + $0x4a4] sm:$0xf0]  ;;  %v3459_v28 = vor.u32 %v3902_v13, %v3456_v14  ;;  %v2559_v29 = vor.u32 %v3677_v15, %v2556_v18 }
  0x42   :  { %2009 = vmatpush.bf16.msrb.mxu3 %v3639_v3  ;;  %1997 = vmatpush.bf16.msrb.mxu2 %v3315_v8  ;;  %v3758_v3 = vld [vmem:[#allocation8 + $0x28c] sm:$0xf]  ;;  %v4198_v5 = vpack.c.bf16 %v114_v58, %v114_v58  ;;  %v3168_v8 = vld [vmem:[#allocation8 + $0x4ec] sm:$0xf0]  ;;  %v2814_v23 = vld [vmem:[#allocation8 + $0x200] sm:$0xf] }
  0x43   :  { %1951 = vmatmul.bf16.vlgmr.msra.gmra.mxu2 %v4192_v60  ;;  %3668 = vmatmul.msk.bf16.vlgmr.msra.gmra.mxu3 %vm1885_vm1, %v4194_v63  ;;  %v2883_v16 = vor.u32 %v3758_v3, %v2880_v6  ;;  %v3171_v17 = vor.u32 %v3830_v7, %v3168_v8  ;;  %v3745_v25 = vld [vmem:[#allocation8 + $0x220] sm:$0xf0]  ;;  %v3390_v30 = vld [vmem:[#allocation8 + $0x680] sm:$0xf]  ;;  %v3420_v35 = vld [vmem:[#allocation8 + $0x6e4] sm:$0xf0] }
  0x44   :  { %1972 = vmatpush.bf16.msrb.mxu0 %v2703_v21  ;;  %1938 = vmatmul.bf16.vlgmr.msra.gmra.mxu1 %v4198_v5  ;;  %v3821_v21 = vld [vmem:[#allocation8 + $0x484] sm:$0xf]  ;;  %v2815_v36 = vor.u32 %v3745_v25, %v2814_v23  ;;  %v3736_v41 = vld [vmem:[#allocation8 + $0x1d8] sm:$0xf0]  ;;  %v3354_v44 = vld [vmem:[#allocation8 + $0x638] sm:$0xf] }
  0x45   :  { %1985 = vmatpush.bf16.msrb.mxu1 %v2991_v26  ;;  %1925 = vmatmul.bf16.vlgmr.msra.gmra.mxu0 %v4196_v4  ;;  %v3102_v26 = vld [vmem:[#allocation8 + $0x440] sm:$0xf]  ;;  %v3889_v31 = vld [vmem:[#allocation8 + $0x6a0] sm:$0xf0]  ;;  %v3135_v33 = vor.u32 %v3821_v21, %v3132_v22  ;;  %v3808_v9 = vld [vmem:[#allocation8 + $0x418] sm:$0xf0] }
  0x46   :  { %2010 = vmatpush.bf16.msrb.mxu3 %v3603_v20  ;;  %1998 = vmatpush.bf16.msrb.mxu2 %v3279_v27  ;;  %v2844_v20 = vld [vmem:[#allocation8 + $0x264] sm:$0xf0]  ;;  %v3817_v27 = vld [vmem:[#allocation8 + $0x460] sm:$0xf0]  ;;  %v3391_v40 = vor.u32 %v3889_v31, %v3390_v30  ;;  %v3880_v45 = vld [vmem:[#allocation8 + $0x658] sm:$0xf0] }
  0x47   :  { %v2847_v32 = vor.u32 %v3749_v19, %v2844_v20  ;;  %v3893_v34 = vld [vmem:[#allocation8 + $0x6c4] sm:$0xf]  ;;  %v3103_v37 = vor.u32 %v3817_v27, %v3102_v26  ;;  %v3952_v50 = vld [vmem:[#allocation8 + $0x898] sm:$0xf0]  ;;  %v3355_v52 = vor.u32 %v3880_v45, %v3354_v44  ;;  %v3727_v53 = vld [vmem:[#allocation8 + $0x190] sm:$0xf0] }
  0x48   :  { %1973 = vmatpush.bf16.msrb.mxu0 %v2667_v39  ;;  %v2778_v39 = vld [vmem:[#allocation8 + $0x1b8] sm:$0xf]  ;;  %v3423_v43 = vor.u32 %v3893_v34, %v3420_v35  ;;  %v3030_v54 = vld [vmem:[#allocation8 + $0x3b0] sm:$0xf]  ;;  %v3799_v55 = vld [vmem:[#allocation8 + $0x3d0] sm:$0xf0] }
  0x49   :  { %1986 = vmatpush.bf16.msrb.mxu1 %v2955_v42  ;;  %v3066_v42 = vld [vmem:[#allocation8 + $0x3f8] sm:$0xf]  ;;  %v2779_v48 = vor.u32 %v3736_v41, %v2778_v39  ;;  %v3871_v57 = vld [vmem:[#allocation8 + $0x610] sm:$0xf0]  ;;  %v3031_v61 = vor.u32 %v3799_v55, %v3030_v54  ;;  %v3606_v62 = vld [vmem:[#allocation8 + $0x830] sm:$0xf] }
  0x4a   :  { %2011 = vmatpush.bf16.msrb.mxu3 %v3567_v38  ;;  %1999 = vmatpush.bf16.msrb.mxu2 %v3243_v46  ;;  %v1599_v38 = vpack.c.b16 %v1311_v24, %v1311_v24  ;;  %v3642_v46 = vld [vmem:[#allocation8 + $0x878] sm:$0xf]  ;;  %v3067_v49 = vor.u32 %v3808_v9, %v3066_v42  ;;  %v2706_v1 = vld [vmem:[#allocation8 + $0x128] sm:$0xf]  ;;  %v3718_v3 = vld [vmem:[#allocation8 + $0x148] sm:$0xf0] }
  0x4b   :  { %v3643_v58 = vor.u32 %v3952_v50, %v3642_v46  ;;  %v2994_v6 = vld [vmem:[#allocation8 + $0x368] sm:$0xf]  ;;  %v3790_v7 = vld [vmem:[#allocation8 + $0x388] sm:$0xf0]  ;;  %v2707_v13 = vor.u32 %v3718_v3, %v2706_v1  ;;  %v3709_v19 = vld [vmem:[#allocation8 + $0x100] sm:$0xf0] }
  0x4c   :  { %1974 = vmatpush.bf16.msrb.mxu0 %v2631_v56  ;;  %v1897_v47 = vsel %vm1889_vm0, %v1599_v38, 0  ;;  %v3318_v56 = vld [vmem:[#allocation8 + $0x5f0] sm:$0xf]  ;;  %v3282_v8 = vld [vmem:[#allocation8 + $0x5a8] sm:$0xf]  ;;  %v2995_v14 = vor.u32 %v3790_v7, %v2994_v6  ;;  %vm2506_vm7 = vcmask 1045508  }
  0x4d   :  { %1987 = vmatpush.bf16.msrb.mxu1 %v2919_v59  ;;  %v3319_v2 = vor.u32 %v3871_v57, %v3318_v56  ;;  %v3570_v15 = vld [vmem:[#allocation8 + $0x7e8] sm:$0xf]  ;;  %v2958_v20 = vld [vmem:[#allocation8 + $0x320] sm:$0xf]  ;;  %v3781_v21 = vld [vmem:[#allocation8 + $0x340] sm:$0xf0] }
  0x4e   :  { %2012 = vmatpush.bf16.msrb.mxu3 %v3531_v51  ;;  %2000 = vmatpush.bf16.msrb.mxu2 %v3207_v0  ;;  %v2742_v51 = vld [vmem:[#allocation8 + $0x170] sm:$0xf]  ;;  %v3943_v0 = vld [vmem:[#allocation8 + $0x850] sm:$0xf0]  ;;  %v3246_v22 = vld [vmem:[#allocation8 + $0x560] sm:$0xf]  ;;  %v2959_v26 = vor.u32 %v3781_v21, %v2958_v20 }
  0x4f   :  { %v2743_v59 = vor.u32 %v3727_v53, %v2742_v51  ;;  %v3853_v23 = vld [vmem:[#allocation8 + $0x580] sm:$0xf0]  ;;  %v3534_v27 = vld [vmem:[#allocation8 + $0x7a0] sm:$0xf]  ;;  %v3700_v31 = vld [vmem:[#allocation8 + $0xb8] sm:$0xf0] }
  0x50   :  { %1975 = vmatpush.bf16.msrb.mxu0 %v2595_v12  ;;  %v3607_v12 = vor.u32 %v3943_v0, %v3606_v62  ;;  %v3247_v30 = vor.u32 %v3853_v23, %v3246_v22  ;;  %v3210_v34 = vld [vmem:[#allocation8 + $0x518] sm:$0xf]  ;;  %v3844_v35 = vld [vmem:[#allocation8 + $0x538] sm:$0xf0]  ;;  %v2598_v41 = vld [vmem:[#allocation8 + $0x50] sm:$0xf] }
  0x51   :  { %1988 = vmatpush.bf16.msrb.mxu1 %v2883_v16  ;;  %v3934_v16 = vld [vmem:[#allocation8 + $0x808] sm:$0xf0]  ;;  %v3498_v39 = vld [vmem:[#allocation8 + $0x758] sm:$0xf]  ;;  %v3211_v42 = vor.u32 %v3844_v35, %v3210_v34  ;;  %v3691_v9 = vld [vmem:[#allocation8 + $0x70] sm:$0xf0] }
  0x52   :  { %2013 = vmatpush.bf16.msrb.mxu3 %v3495_v11  ;;  %2001 = vmatpush.bf16.msrb.mxu2 %v3171_v17  ;;  %v3862_v11 = vld [vmem:[#allocation8 + $0x5c8] sm:$0xf0]  ;;  %v2670_v17 = vld [vmem:[#allocation8 + $0xe0] sm:$0xf]  ;;  %v3571_v24 = vor.u32 %v3934_v16, %v3570_v15  ;;  %v3763_v44 = vld [vmem:[#allocation8 + $0x2b0] sm:$0xf0]  ;;  %v2599_v50 = vor.u32 %v3691_v9, %v2598_v41 }
  0x53   :  { %v3283_v18 = vor.u32 %v3862_v11, %v3282_v8  ;;  %v2671_v25 = vor.u32 %v3709_v19, %v2670_v17  ;;  %v3174_v45 = vld [vmem:[#allocation8 + $0x4d0] sm:$0xf]  ;;  %v3835_v46 = vld [vmem:[#allocation8 + $0x4f0] sm:$0xf0]  ;;  %v3682_v53 = vld [vmem:[#allocation8 + $0x28] sm:$0xf0] }
  0x54   :  { %1976 = vmatpush.bf16.msrb.mxu0 %v2559_v29  ;;  %v2634_v29 = vld [vmem:[#allocation8 + $0x98] sm:$0xf]  ;;  %v2850_v54 = vld [vmem:[#allocation8 + $0x248] sm:$0xf]  ;;  %v3175_v55 = vor.u32 %v3835_v46, %v3174_v45  ;;  %v3754_v56 = vld [vmem:[#allocation8 + $0x268] sm:$0xf0] }
  0x55   :  { %1989 = vmatpush.bf16.msrb.mxu1 %v2847_v32  ;;  %v2922_v32 = vld [vmem:[#allocation8 + $0x2d8] sm:$0xf]  ;;  %v3138_v57 = vld [vmem:[#allocation8 + $0x488] sm:$0xf]  ;;  %v3813_v0 = vld [vmem:[#allocation8 + $0x444] sm:$0xf]  ;;  %v2851_v8 = vor.u32 %v3754_v56, %v2850_v54 }
  0x56   :  { %2014 = vmatpush.bf16.msrb.mxu3 %v3459_v28  ;;  %2002 = vmatpush.bf16.msrb.mxu2 %v3135_v33  ;;  %v3925_v28 = vld [vmem:[#allocation8 + $0x7c0] sm:$0xf0]  ;;  %v3772_v33 = vld [vmem:[#allocation8 + $0x2f8] sm:$0xf0]  ;;  %v2816_v62 = vld [vmem:[#allocation8 + $0x224] sm:$0xf0] }
  0x57   :  { %1977 = vmatmul.bf16.vlgmr.msrb.gmra.mxu0 %v4196_v4  ;;  %v2923_v38 = vor.u32 %v3772_v33, %v2922_v32  ;;  %v3885_v3 = vld [vmem:[#allocation8 + $0x684] sm:$0xf]  ;;  %v3392_v6 = vld [vmem:[#allocation8 + $0x6a4] sm:$0xf0]  ;;  %v3732_v17 = vld [vmem:[#allocation8 + $0x1bc] sm:$0xf] }
  0x58   :  { %2021 = vmatpush.bf16.msra.mxu0 %v2815_v36  ;;  %1990 = vmatmul.bf16.vlgmr.msrb.gmra.mxu1 %v4198_v5  ;;  %v3535_v36 = vor.u32 %v3925_v28, %v3534_v27  ;;  %v3426_v11 = vld [vmem:[#allocation8 + $0x6c8] sm:$0xf]  ;;  %v3804_v19 = vld [vmem:[#allocation8 + $0x3fc] sm:$0xf]  ;;  %v3068_v21 = vld [vmem:[#allocation8 + $0x41c] sm:$0xf0] }
  0x59   :  { %2034 = vmatpush.bf16.msra.mxu1 %v3103_v37  ;;  %2003 = vmatmul.bf16.vlgmr.msrb.gmra.mxu2 %v4192_v60  ;;  %v2635_v37 = vor.u32 %v3700_v31, %v2634_v29  ;;  %v3876_v22 = vld [vmem:[#allocation8 + $0x63c] sm:$0xf]  ;;  %v3356_v23 = vld [vmem:[#allocation8 + $0x65c] sm:$0xf0]  ;;  %v3071_v28 = vor.u32 %v3804_v19, %v3068_v21  ;;  %v2744_v31 = vld [vmem:[#allocation8 + $0x194] sm:$0xf0] }
  0x5a   :  { %2047 = vmatpush.bf16.msra.mxu2 %v3391_v40  ;;  %2015 = vmatpush.bf16.msrb.mxu3 %v3423_v43  ;;  %v3916_v40 = vld [vmem:[#allocation8 + $0x778] sm:$0xf0]  ;;  %v2886_v43 = vld [vmem:[#allocation8 + $0x290] sm:$0xf]  ;;  %v3644_v27 = vld [vmem:[#allocation8 + $0x89c] sm:$0xf0]  ;;  %v3359_v29 = vor.u32 %v3876_v22, %v3356_v23 }
  0x5b   :  { %v2887_v51 = vor.u32 %v3763_v44, %v2886_v43  ;;  %v3795_v32 = vld [vmem:[#allocation8 + $0x3b4] sm:$0xf]  ;;  %v3032_v33 = vld [vmem:[#allocation8 + $0x3d4] sm:$0xf0]  ;;  %v2708_v9 = vld [vmem:[#allocation8 + $0x14c] sm:$0xf0] }
  0x5c   :  { %2022 = vmatpush.bf16.msra.mxu0 %v2779_v48  ;;  %v3462_v48 = vld [vmem:[#allocation8 + $0x710] sm:$0xf]  ;;  %v3867_v34 = vld [vmem:[#allocation8 + $0x5f4] sm:$0xf]  ;;  %v3320_v35 = vld [vmem:[#allocation8 + $0x614] sm:$0xf0] }
  0x5d   :  { %2035 = vmatpush.bf16.msra.mxu1 %v3067_v49  ;;  %3669 = vmatmul.msk.bf16.vlgmr.msrb.gmra.mxu3 %vm1885_vm1, %v4194_v63  ;;  %v3907_v49 = vld [vmem:[#allocation8 + $0x730] sm:$0xf0]  ;;  %v3323_v41 = vor.u32 %v3867_v34, %v3320_v35  ;;  %v3786_v43 = vld [vmem:[#allocation8 + $0x36c] sm:$0xf]  ;;  %v2996_v44 = vld [vmem:[#allocation8 + $0x38c] sm:$0xf0] }
  0x5e   :  { %2060 = vmatpush.bf16.msra.mxu3 %v1897_v47  ;;  %2048 = vmatpush.bf16.msra.mxu2 %v3355_v52  ;;  %v3499_v47 = vor.u32 %v3916_v40, %v3498_v39  ;;  %v2562_v52 = vld [vmem:[#allocation8 + $0x8] sm:$0xf]  ;;  %v3463_v1 = vor.u32 %v3907_v49, %v3462_v48  ;;  %v3608_v39 = vld [vmem:[#allocation8 + $0x854] sm:$0xf0]  ;;  %v3035_v40 = vor.u32 %v3795_v32, %v3032_v33  ;;  %v3858_v45 = vld [vmem:[#allocation8 + $0x5ac] sm:$0xf] }
  0x5f   :  { %v2563_v7 = vor.u32 %v3682_v53, %v2562_v52  ;;  %v3284_v46 = vld [vmem:[#allocation8 + $0x5cc] sm:$0xf0]  ;;  %v3930_v49 = vld [vmem:[#allocation8 + $0x7ec] sm:$0xf]  ;;  %v3705_v53 = vld [vmem:[#allocation8 + $0xe4] sm:$0xf] }
  0x60   :  { %2023 = vmatpush.bf16.msra.mxu0 %v2743_v59  ;;  %v1312_v59 = vunpack.c.h.b16 %v4205_v10  ;;  %v3395_v10 = vor.u32 %v3885_v3, %v3392_v6  ;;  %v3287_v52 = vor.u32 %v3858_v45, %v3284_v46  ;;  %v2672_v54 = vld [vmem:[#allocation8 + $0x104] sm:$0xf0]  ;;  %v3696_v3 = vld [vmem:[#allocation8 + $0x9c] sm:$0xf]  ;;  %v2636_v6 = vld [vmem:[#allocation8 + $0xbc] sm:$0xf0] }
  0x61   :  { %2036 = vmatpush.bf16.msra.mxu1 %v3031_v61  ;;  %v3741_v61 = vld [vmem:[#allocation8 + $0x204] sm:$0xf]  ;;  %v2960_v56 = vld [vmem:[#allocation8 + $0x344] sm:$0xf0]  ;;  %v2600_v19 = vld [vmem:[#allocation8 + $0x74] sm:$0xf0] }
  0x62   :  { %2061 = vmatpush.bf16.msra.mxu3 %v3643_v58  ;;  %2049 = vmatpush.bf16.msra.mxu2 %v3319_v2  ;;  %v3826_v58 = vld [vmem:[#allocation8 + $0x4a8] sm:$0xf0]  ;;  %v3104_v2 = vld [vmem:[#allocation8 + $0x464] sm:$0xf0]  ;;  %v1600_v15 = vpack.c.b16 %v1312_v59, %v1312_v59  ;;  %v2888_v21 = vld [vmem:[#allocation8 + $0x2b4] sm:$0xf0] }
  0x63   :  { %v3107_v16 = vor.u32 %v3813_v0, %v3104_v2  ;;  %v3536_v0 = vld [vmem:[#allocation8 + $0x7c4] sm:$0xf0]  ;;  %v3831_v22 = vld [vmem:[#allocation8 + $0x4d4] sm:$0xf]  ;;  %v3176_v23 = vld [vmem:[#allocation8 + $0x4f4] sm:$0xf0] }
  0x64   :  { %2024 = vmatpush.bf16.msra.mxu0 %v2707_v13  ;;  %v3139_v13 = vor.u32 %v3826_v58, %v3138_v57  ;;  %v3849_v57 = vld [vmem:[#allocation8 + $0x564] sm:$0xf]  ;;  %v3248_v58 = vld [vmem:[#allocation8 + $0x584] sm:$0xf0]  ;;  %v3179_v32 = vor.u32 %v3831_v22, %v3176_v23  ;;  %v3750_v33 = vld [vmem:[#allocation8 + $0x24c] sm:$0xf] }
  0x65   :  { %2037 = vmatpush.bf16.msra.mxu1 %v2995_v14  ;;  %v2819_v14 = vor.u32 %v3741_v61, %v2816_v62  ;;  %v2675_v61 = vor.u32 %v3705_v53, %v2672_v54  ;;  %v3921_v62 = vld [vmem:[#allocation8 + $0x7a4] sm:$0xf]  ;;  %v3251_v2 = vor.u32 %v3849_v57, %v3248_v58  ;;  %v2852_v34 = vld [vmem:[#allocation8 + $0x26c] sm:$0xf0]  ;;  %v3822_v35 = vld [vmem:[#allocation8 + $0x48c] sm:$0xf] }
  0x66   :  { %2062 = vmatpush.bf16.msra.mxu3 %v3607_v12  ;;  %2050 = vmatpush.bf16.msra.mxu2 %v3283_v18  ;;  %v3898_v12 = vld [vmem:[#allocation8 + $0x6e8] sm:$0xf0]  ;;  %v2780_v18 = vld [vmem:[#allocation8 + $0x1dc] sm:$0xf0]  ;;  %v3428_v46 = vld [vmem:[#allocation8 + $0x6ec] sm:$0xf0] }
  0x67   :  { %v3427_v20 = vor.u32 %v3898_v12, %v3426_v11  ;;  %v3840_v11 = vld [vmem:[#allocation8 + $0x51c] sm:$0xf]  ;;  %v3212_v12 = vld [vmem:[#allocation8 + $0x53c] sm:$0xf0]  ;;  %v3894_v45 = vld [vmem:[#allocation8 + $0x6cc] sm:$0xf] }
  0x68   :  { %2025 = vmatpush.bf16.msra.mxu0 %v2671_v25  ;;  %v2783_v25 = vor.u32 %v3732_v17, %v2780_v18  ;;  %v3215_v18 = vor.u32 %v3840_v11, %v3212_v12  ;;  %v3431_v54 = vor.u32 %v3894_v45, %v3428_v46  ;;  %v3809_v57 = vld [vmem:[#allocation8 + $0x420] sm:$0xf0]  ;;  %v3362_v58 = vld [vmem:[#allocation8 + $0x640] sm:$0xf]  ;;  %v3800_v11 = vld [vmem:[#allocation8 + $0x3d8] sm:$0xf0] }
  0x69   :  { %2038 = vmatpush.bf16.msra.mxu1 %v2959_v26  ;;  %v3948_v26 = vld [vmem:[#allocation8 + $0x87c] sm:$0xf]  ;;  %v3791_v22 = vld [vmem:[#allocation8 + $0x390] sm:$0xf0]  ;;  %v2930_v45 = vld [vmem:[#allocation8 + $0x2e0] sm:$0xf] }
  0x6a   :  { %2063 = vmatpush.bf16.msra.mxu3 %v3571_v24  ;;  %2051 = vmatpush.bf16.msra.mxu2 %v3247_v30  ;;  %v1900_v24 = vsel %vm1889_vm0, %v1600_v15, 0  ;;  %v3723_v30 = vld [vmem:[#allocation8 + $0x174] sm:$0xf]  ;;  %v3912_v15 = vld [vmem:[#allocation8 + $0x75c] sm:$0xf]  ;;  %vm2508_vm8 = vcmask 1043456  }
  0x6b   :  { %v3773_v46 = vld [vmem:[#allocation8 + $0x300] sm:$0xf0]  ;;  %s4143_s4 = smov [#allocation11]   ;;  %s2535_s19 = sshll.u32 %s4317_s5, 4  ;;  %s2536_s19 = int_to_ptr.hbm [resolvable:$true] %s2535_s19 }
  0x6c   :  { %2026 = vmatpush.bf16.msra.mxu0 %v2635_v37  ;;  %v2747_v37 = vor.u32 %v3723_v30, %v2744_v31  ;;  %v2564_v30 = vld [vmem:[#allocation8 + $0x2c] sm:$0xf0]  ;;  %s2533_s16 = sshll.u32 %s4143_s4, 4  ;;  %s2534_s16 = int_to_ptr.vmem [resolvable:$true] %s2533_s16 }
  0x6d   :  { %2039 = vmatpush.bf16.msra.mxu1 %v2923_v38  ;;  %v3939_v38 = vld [vmem:[#allocation8 + $0x834] sm:$0xf] }
  0x6e   :  { %2064 = vmatpush.bf16.msra.mxu3 %v3535_v36  ;;  %2052 = vmatpush.bf16.msra.mxu2 %v3211_v42  ;;  %v3647_v36 = vor.u32 %v3948_v26, %v3644_v27  ;;  %v3714_v42 = vld [vmem:[#allocation8 + $0x12c] sm:$0xf]  ;;  %v3903_v26 = vld [vmem:[#allocation8 + $0x714] sm:$0xf] }
  0x6f   :  { %v2711_v48 = vor.u32 %v3714_v42, %v2708_v9  ;;  %v3818_v42 = vld [vmem:[#allocation8 + $0x468] sm:$0xf0]  ;;  %v3398_v9 = vld [vmem:[#allocation8 + $0x688] sm:$0xf] }
  0x70   :  { %2027 = vmatpush.bf16.msra.mxu0 %v2599_v50  ;;  %v3572_v50 = vld [vmem:[#allocation8 + $0x80c] sm:$0xf0] }
  0x71   :  { %2040 = vmatpush.bf16.msra.mxu1 %v2887_v51  ;;  %v2999_v51 = vor.u32 %v3786_v43, %v2996_v44  ;;  %v3575_v59 = vor.u32 %v3930_v49, %v3572_v50  ;;  %v3890_v44 = vld [vmem:[#allocation8 + $0x6a8] sm:$0xf0] }
  0x72   :  { %2065 = vmatpush.bf16.msra.mxu3 %v3499_v47  ;;  %2053 = vmatpush.bf16.msra.mxu2 %v3175_v55  ;;  %v3611_v47 = vor.u32 %v3939_v38, %v3608_v39  ;;  %v3777_v55 = vld [vmem:[#allocation8 + $0x324] sm:$0xf]  ;;  %v2822_v38 = vld [vmem:[#allocation8 + $0x208] sm:$0xf]  ;;  %v3746_v39 = vld [vmem:[#allocation8 + $0x228] sm:$0xf0]  ;;  %v3399_v53 = vor.u32 %v3890_v44, %v3398_v9 }
  0x73   :  { %v2823_v50 = vor.u32 %v3746_v39, %v2822_v38  ;;  %v3854_v38 = vld [vmem:[#allocation8 + $0x588] sm:$0xf0]  ;;  %v3542_v39 = vld [vmem:[#allocation8 + $0x7a8] sm:$0xf]  ;;  %v2642_v9 = vld [vmem:[#allocation8 + $0xa0] sm:$0xf] }
  0x74   :  { %2028 = vmatpush.bf16.msra.mxu0 %v2563_v7  ;;  %v3768_v7 = vld [vmem:[#allocation8 + $0x2dc] sm:$0xf]  ;;  %v3701_v44 = vld [vmem:[#allocation8 + $0xc0] sm:$0xf0] }
  0x75   :  { %2041 = vmatpush.bf16.msra.mxu1 %v2851_v8  ;;  %v2924_v8 = vld [vmem:[#allocation8 + $0x2fc] sm:$0xf0] }
  0x76   :  { %2066 = vmatpush.bf16.msra.mxu3 %v3463_v1  ;;  %2054 = vmatpush.bf16.msra.mxu2 %v3139_v13  ;;  %v2963_v1 = vor.u32 %v3777_v55, %v2960_v56  ;;  %v3539_v13 = vor.u32 %v3921_v62, %v3536_v0  ;;  %v2927_v17 = vor.u32 %v3768_v7, %v2924_v8  ;;  %v3737_v55 = vld [vmem:[#allocation8 + $0x1e0] sm:$0xf0]  ;;  %v3074_v56 = vld [vmem:[#allocation8 + $0x400] sm:$0xf]  ;;  %v3728_v7 = vld [vmem:[#allocation8 + $0x198] sm:$0xf0] }
  0x77   :  { %2029 = vmatmul.bf16.vlgmr.msra.gmra.mxu0 %v4196_v4  ;;  %v3650_v62 = vld [vmem:[#allocation8 + $0x880] sm:$0xf]  ;;  %v3953_v0 = vld [vmem:[#allocation8 + $0x8a0] sm:$0xf0]  ;;  %v3038_v8 = vld [vmem:[#allocation8 + $0x3b8] sm:$0xf] }
  0x78   :  { %2073 = vmatpush.bf16.msrb.mxu0 %v2819_v14  ;;  %2042 = vmatmul.bf16.vlgmr.msra.gmra.mxu1 %v4198_v5  ;;  %v2639_v14 = vor.u32 %v3696_v3, %v2636_v6  ;;  %v2750_v3 = vld [vmem:[#allocation8 + $0x178] sm:$0xf]  ;;  %v3651_v12 = vor.u32 %v3953_v0, %v3650_v62  ;;  %v3836_v62 = vld [vmem:[#allocation8 + $0x4f8] sm:$0xf0] }
  0x79   :  { %2086 = vmatpush.bf16.msrb.mxu1 %v3107_v16  ;;  %2055 = vmatmul.bf16.vlgmr.msra.gmra.mxu2 %v4192_v60  ;;  %v3500_v16 = vld [vmem:[#allocation8 + $0x77c] sm:$0xf0]  ;;  %v3470_v0 = vld [vmem:[#allocation8 + $0x718] sm:$0xf] }
  0x7a   :  { %2099 = vmatpush.bf16.msrb.mxu2 %v3395_v10  ;;  %2067 = vmatpush.bf16.msra.mxu3 %v3427_v20  ;;  %v3687_v10 = vld [vmem:[#allocation8 + $0x54] sm:$0xf] }
  0x7b   :  { %v3759_v20 = vld [vmem:[#allocation8 + $0x294] sm:$0xf]  ;;  %v2603_v27 = vor.u32 %v3687_v10, %v2600_v19  ;;  %v2751_v10 = vor.u32 %v3728_v7, %v2750_v3 }
  0x7c   :  { %2074 = vmatpush.bf16.msrb.mxu0 %v2783_v25  ;;  %v3503_v25 = vor.u32 %v3912_v15, %v3500_v16  ;;  %v2891_v31 = vor.u32 %v3759_v20, %v2888_v21  ;;  %v3614_v15 = vld [vmem:[#allocation8 + $0x838] sm:$0xf]  ;;  %v3944_v16 = vld [vmem:[#allocation8 + $0x858] sm:$0xf0]  ;;  %v3719_v20 = vld [vmem:[#allocation8 + $0x150] sm:$0xf0] }
  0x7d   :  { %2087 = vmatpush.bf16.msrb.mxu1 %v3071_v28  ;;  %3670 = vmatmul.msk.bf16.vlgmr.msra.gmra.mxu3 %vm1885_vm1, %v4194_v63  ;;  %v3464_v28 = vld [vmem:[#allocation8 + $0x734] sm:$0xf0]  ;;  %v3002_v21 = vld [vmem:[#allocation8 + $0x370] sm:$0xf]  ;;  %v3615_v23 = vor.u32 %v3944_v16, %v3614_v15  ;;  %v3683_v7 = vld [vmem:[#allocation8 + $0x30] sm:$0xf0] }
  0x7e   :  { %2112 = vmatpush.bf16.msrb.mxu3 %v1900_v24  ;;  %2100 = vmatpush.bf16.msrb.mxu2 %v3359_v29  ;;  %v4221_v24 = vld [vmem:[#allocation8 + $0x8c8] sm:$0x33] }
  0x7f   :  { %v3678_v29 = vld [vmem:[#allocation8 + $0xc] sm:$0xf]  ;;  %v1314_v15 = vunpack.c.h.b16 %v4221_v24 }
  0x80   :  { %2075 = vmatpush.bf16.msrb.mxu0 %v2747_v37  ;;  %v3140_v37 = vld [vmem:[#allocation8 + $0x4ac] sm:$0xf0]  ;;  %v2567_v43 = vor.u32 %v3678_v29, %v2564_v30  ;;  %v3003_v30 = vor.u32 %v3791_v22, %v3002_v21 }
  0x81   :  { %2088 = vmatpush.bf16.msrb.mxu1 %v3035_v40  ;;  %v3467_v40 = vor.u32 %v3903_v26, %v3464_v28  ;;  %v3863_v26 = vld [vmem:[#allocation8 + $0x5d0] sm:$0xf0]  ;;  %v3400_v21 = vld [vmem:[#allocation8 + $0x6ac] sm:$0xf0] }
  0x82   :  { %2113 = vmatpush.bf16.msrb.mxu3 %v3647_v36  ;;  %2101 = vmatpush.bf16.msrb.mxu2 %v3323_v41  ;;  %v1313_v36 = vunpack.c.l.b16 %v4221_v24  ;;  %v3110_v41 = vld [vmem:[#allocation8 + $0x448] sm:$0xf]  ;;  %v3935_v28 = vld [vmem:[#allocation8 + $0x810] sm:$0xf0] }
  0x84   :  { %2076 = vmatpush.bf16.msrb.mxu0 %v2711_v48  ;;  %v3143_v48 = vor.u32 %v3822_v35, %v3140_v37  ;;  %v1601_v49 = vpack.c.b16 %v1313_v36, %v1313_v36  ;;  %v3782_v35 = vld [vmem:[#allocation8 + $0x348] sm:$0xf0]  ;;  %v3254_v37 = vld [vmem:[#allocation8 + $0x568] sm:$0xf] }
  0x85   :  { %2089 = vmatpush.bf16.msrb.mxu1 %v2999_v51  ;;  %v3111_v51 = vor.u32 %v3818_v42, %v3110_v41 }
  0x86   :  { %2114 = vmatpush.bf16.msrb.mxu3 %v3611_v47  ;;  %2102 = vmatpush.bf16.msrb.mxu2 %v3287_v52  ;;  %v2855_v47 = vor.u32 %v3750_v33, %v2852_v34  ;;  %v2786_v52 = vld [vmem:[#allocation8 + $0x1c0] sm:$0xf]  ;;  %v3710_v33 = vld [vmem:[#allocation8 + $0x108] sm:$0xf0]  ;;  %v2966_v34 = vld [vmem:[#allocation8 + $0x328] sm:$0xf] }
  0x87   :  { %v2967_v42 = vor.u32 %v3782_v35, %v2966_v34  ;;  %v3076_v35 = vld [vmem:[#allocation8 + $0x424] sm:$0xf0] }
  0x88   :  { %2077 = vmatpush.bf16.msrb.mxu0 %v2675_v61  ;;  %v1903_v61 = vsel %vm1889_vm0, %v1601_v49, 0  ;;  %v3845_v49 = vld [vmem:[#allocation8 + $0x540] sm:$0xf0] }
  0x89   :  { %2090 = vmatpush.bf16.msrb.mxu1 %v2963_v1  ;;  %v2787_v1 = vor.u32 %v3737_v55, %v2786_v52  ;;  %v2643_v52 = vor.u32 %v3701_v44, %v2642_v9  ;;  %v2752_v44 = vld [vmem:[#allocation8 + $0x19c] sm:$0xf0] }
  0x8a   :  { %2115 = vmatpush.bf16.msrb.mxu3 %v3575_v59  ;;  %2103 = vmatpush.bf16.msrb.mxu2 %v3251_v2  ;;  %v3881_v59 = vld [vmem:[#allocation8 + $0x660] sm:$0xf0]  ;;  %v3075_v2 = vor.u32 %v3809_v57, %v3074_v56  ;;  %v3692_v56 = vld [vmem:[#allocation8 + $0x78] sm:$0xf0]  ;;  %v2894_v57 = vld [vmem:[#allocation8 + $0x298] sm:$0xf] }
  0x8b   :  { %v3363_v6 = vor.u32 %v3881_v59, %v3362_v58  ;;  %v3764_v58 = vld [vmem:[#allocation8 + $0x2b8] sm:$0xf0] }
  0x8c   :  { %2078 = vmatpush.bf16.msrb.mxu0 %v2639_v14  ;;  %v3872_v14 = vld [vmem:[#allocation8 + $0x618] sm:$0xf0]  ;;  %v2895_v3 = vor.u32 %v3764_v58, %v2894_v57  ;;  %v3787_v57 = vld [vmem:[#allocation8 + $0x374] sm:$0xf]  ;;  %v3004_v58 = vld [vmem:[#allocation8 + $0x394] sm:$0xf0] }
  0x8d   :  { %2091 = vmatpush.bf16.msrb.mxu1 %v2927_v17  ;;  %v3039_v17 = vor.u32 %v3800_v11, %v3038_v8  ;;  %v2858_v8 = vld [vmem:[#allocation8 + $0x250] sm:$0xf] }
  0x8e   :  { %2116 = vmatpush.bf16.msrb.mxu3 %v3539_v13  ;;  %2104 = vmatpush.bf16.msrb.mxu2 %v3215_v18  ;;  %v3326_v13 = vld [vmem:[#allocation8 + $0x5f8] sm:$0xf]  ;;  %v2714_v18 = vld [vmem:[#allocation8 + $0x130] sm:$0xf] }
  0x8f   :  { %v3327_v19 = vor.u32 %v3872_v14, %v3326_v13  ;;  %v2715_v29 = vor.u32 %v3719_v20, %v2714_v18  ;;  %v3146_v13 = vld [vmem:[#allocation8 + $0x490] sm:$0xf]  ;;  %v3827_v14 = vld [vmem:[#allocation8 + $0x4b0] sm:$0xf0]  ;;  %v3814_v18 = vld [vmem:[#allocation8 + $0x44c] sm:$0xf] }
  0x90   :  { %2079 = vmatpush.bf16.msrb.mxu0 %v2603_v27  ;;  %v3578_v27 = vld [vmem:[#allocation8 + $0x7f0] sm:$0xf]  ;;  %v3886_v20 = vld [vmem:[#allocation8 + $0x68c] sm:$0xf] }
  0x91   :  { %2092 = vmatpush.bf16.msrb.mxu1 %v2891_v31  ;;  %v2678_v31 = vld [vmem:[#allocation8 + $0xe8] sm:$0xf]  ;;  %v3579_v36 = vor.u32 %v3935_v28, %v3578_v27  ;;  %v3147_v27 = vor.u32 %v3827_v14, %v3146_v13  ;;  %v3850_v13 = vld [vmem:[#allocation8 + $0x56c] sm:$0xf]  ;;  %v3256_v14 = vld [vmem:[#allocation8 + $0x58c] sm:$0xf0] }
  0x92   :  { %2117 = vmatpush.bf16.msrb.mxu3 %v3503_v25  ;;  %2105 = vmatpush.bf16.msrb.mxu2 %v3179_v32  ;;  %v3290_v25 = vld [vmem:[#allocation8 + $0x5b0] sm:$0xf]  ;;  %v2679_v41 = vor.u32 %v3710_v33, %v2678_v31  ;;  %v3733_v31 = vld [vmem:[#allocation8 + $0x1c4] sm:$0xf] }
  0x93   :  { %v3291_v32 = vor.u32 %v3863_v26, %v3290_v25  ;;  %v3434_v25 = vld [vmem:[#allocation8 + $0x6d0] sm:$0xf]  ;;  %v3899_v26 = vld [vmem:[#allocation8 + $0x6f0] sm:$0xf0]  ;;  %v3805_v33 = vld [vmem:[#allocation8 + $0x404] sm:$0xf] }
  0x94   :  { %2080 = vmatpush.bf16.msrb.mxu0 %v2567_v43  ;;  %v3255_v43 = vor.u32 %v3854_v38, %v3254_v37  ;;  %v3435_v34 = vor.u32 %v3899_v26, %v3434_v25  ;;  %v3364_v37 = vld [vmem:[#allocation8 + $0x664] sm:$0xf0]  ;;  %v3841_v25 = vld [vmem:[#allocation8 + $0x524] sm:$0xf] }
  0x95   :  { %2093 = vmatpush.bf16.msrb.mxu1 %v2855_v47  ;;  %v3220_v26 = vld [vmem:[#allocation8 + $0x544] sm:$0xf0] }
  0x96   :  { %2118 = vmatpush.bf16.msrb.mxu3 %v3467_v40  ;;  %2106 = vmatpush.bf16.msrb.mxu2 %v3143_v48  ;;  %v3926_v40 = vld [vmem:[#allocation8 + $0x7c8] sm:$0xf0]  ;;  %v3218_v48 = vld [vmem:[#allocation8 + $0x520] sm:$0xf] }
  0x97   :  { %2081 = vmatmul.bf16.vlgmr.msrb.gmra.mxu0 %v4196_v4  ;;  %v3543_v47 = vor.u32 %v3926_v40, %v3542_v39  ;;  %v3219_v55 = vor.u32 %v3845_v49, %v3218_v48  ;;  %v3949_v40 = vld [vmem:[#allocation8 + $0x884] sm:$0xf]  ;;  %v3328_v48 = vld [vmem:[#allocation8 + $0x61c] sm:$0xf0] }
  0x98   :  { %2125 = vmatpush.bf16.msra.mxu0 %v2823_v50  ;;  %2094 = vmatmul.bf16.vlgmr.msrb.gmra.mxu1 %v4198_v5  ;;  %v3506_v50 = vld [vmem:[#allocation8 + $0x760] sm:$0xf] }
  0x99   :  { %2138 = vmatpush.bf16.msra.mxu1 %v3111_v51  ;;  %2107 = vmatmul.bf16.vlgmr.msrb.gmra.mxu2 %v4192_v60  ;;  %v3917_v51 = vld [vmem:[#allocation8 + $0x780] sm:$0xf0] }
  0x9a   :  { %2151 = vmatpush.bf16.msra.mxu2 %v3399_v53  ;;  %2119 = vmatpush.bf16.msrb.mxu3 %v3431_v54  ;;  %v2931_v53 = vor.u32 %v3773_v46, %v2930_v45  ;;  %v2606_v54 = vld [vmem:[#allocation8 + $0x58] sm:$0xf]  ;;  %v3507_v59 = vor.u32 %v3917_v51, %v3506_v50  ;;  %v3796_v45 = vld [vmem:[#allocation8 + $0x3bc] sm:$0xf]  ;;  %v3040_v46 = vld [vmem:[#allocation8 + $0x3dc] sm:$0xf0] }
  0x9b   :  { %v3940_v51 = vld [vmem:[#allocation8 + $0x83c] sm:$0xf] }
  0x9c   :  { %2126 = vmatpush.bf16.msra.mxu0 %v2787_v1  ;;  %v3908_v1 = vld [vmem:[#allocation8 + $0x738] sm:$0xf0] }
  0x9d   :  { %2139 = vmatpush.bf16.msra.mxu1 %v3075_v2  ;;  %3671 = vmatmul.msk.bf16.vlgmr.msrb.gmra.mxu3 %vm1885_vm1, %v4194_v63  ;;  %v2607_v2 = vor.u32 %v3692_v56, %v2606_v54  ;;  %v3471_v16 = vor.u32 %v3908_v1, %v3470_v0  ;;  %v2716_v56 = vld [vmem:[#allocation8 + $0x154] sm:$0xf0]  ;;  %v3931_v1 = vld [vmem:[#allocation8 + $0x7f4] sm:$0xf] }
  0x9e   :  { %2164 = vmatpush.bf16.msra.mxu3 %v1903_v61  ;;  %2152 = vmatpush.bf16.msra.mxu2 %v3363_v6  ;;  %v3182_v61 = vld [vmem:[#allocation8 + $0x4d8] sm:$0xf]  ;;  %v2570_v6 = vld [vmem:[#allocation8 + $0x10] sm:$0xf] }
  0x9f   :  { %v3183_v11 = vor.u32 %v3836_v62, %v3182_v61  ;;  %v2571_v22 = vor.u32 %v3683_v7, %v2570_v6  ;;  %v3292_v61 = vld [vmem:[#allocation8 + $0x5d4] sm:$0xf0]  ;;  %v3706_v7 = vld [vmem:[#allocation8 + $0xec] sm:$0xf] }
  0xa0   :  { %2127 = vmatpush.bf16.msra.mxu0 %v2751_v10  ;;  %v3742_v10 = vld [vmem:[#allocation8 + $0x20c] sm:$0xf] }
  0xa1   :  { %2140 = vmatpush.bf16.msra.mxu1 %v3039_v17  ;;  %v2824_v17 = vld [vmem:[#allocation8 + $0x22c] sm:$0xf0] }
  0xa2   :  { %2165 = vmatpush.bf16.msra.mxu3 %v3651_v12  ;;  %2153 = vmatpush.bf16.msra.mxu2 %v3327_v19  ;;  %v3755_v12 = vld [vmem:[#allocation8 + $0x270] sm:$0xf0]  ;;  %v3112_v19 = vld [vmem:[#allocation8 + $0x46c] sm:$0xf0]  ;;  %v2827_v28 = vor.u32 %v3742_v10, %v2824_v17  ;;  %v3922_v10 = vld [vmem:[#allocation8 + $0x7ac] sm:$0xf] }
  0xa3   :  { %v3115_v24 = vor.u32 %v3814_v18, %v3112_v19  ;;  %v3544_v17 = vld [vmem:[#allocation8 + $0x7cc] sm:$0xf0]  ;;  %v3259_v19 = vor.u32 %v3850_v13, %v3256_v14  ;;  %v3738_v13 = vld [vmem:[#allocation8 + $0x1e8] sm:$0xf0]  ;;  %v3082_v14 = vld [vmem:[#allocation8 + $0x408] sm:$0xf] }
  0xa4   :  { %2128 = vmatpush.bf16.msra.mxu0 %v2715_v29  ;;  %v1602_v29 = vpack.c.b16 %v1314_v15, %v1314_v15 }
  0xa5   :  { %2141 = vmatpush.bf16.msra.mxu1 %v3003_v30  ;;  %v3403_v30 = vor.u32 %v3886_v20, %v3400_v21  ;;  %v3697_v20 = vld [vmem:[#allocation8 + $0xa4] sm:$0xf]  ;;  %v2644_v21 = vld [vmem:[#allocation8 + $0xc4] sm:$0xf0] }
  0xa6   :  { %2166 = vmatpush.bf16.msra.mxu3 %v3615_v23  ;;  %2154 = vmatpush.bf16.msra.mxu2 %v3291_v32  ;;  %v2859_v23 = vor.u32 %v3755_v12, %v2858_v8  ;;  %v2788_v32 = vld [vmem:[#allocation8 + $0x1e4] sm:$0xf0]  ;;  %v1906_v38 = vsel %vm1889_vm0, %v1602_v29, 0  ;;  %v2680_v8 = vld [vmem:[#allocation8 + $0x10c] sm:$0xf0] }
  0xa7   :  { %v2791_v39 = vor.u32 %v3733_v31, %v2788_v32  ;;  %v2968_v12 = vld [vmem:[#allocation8 + $0x34c] sm:$0xf0]  ;;  %v3913_v29 = vld [vmem:[#allocation8 + $0x764] sm:$0xf]  ;;  %v3223_v32 = vor.u32 %v3841_v25, %v3220_v26 }
  0xa8   :  { %2129 = vmatpush.bf16.msra.mxu0 %v2679_v41  ;;  %v3652_v41 = vld [vmem:[#allocation8 + $0x8a4] sm:$0xf0] }
  0xa9   :  { %2142 = vmatpush.bf16.msra.mxu1 %v2967_v42  ;;  %v3079_v42 = vor.u32 %v3805_v33, %v3076_v35  ;;  %v3655_v49 = vor.u32 %v3949_v40, %v3652_v41  ;;  %v2608_v33 = vld [vmem:[#allocation8 + $0x7c] sm:$0xf0]  ;;  %v3904_v40 = vld [vmem:[#allocation8 + $0x71c] sm:$0xf] }
  0xaa   :  { %2167 = vmatpush.bf16.msra.mxu3 %v3579_v36  ;;  %2155 = vmatpush.bf16.msra.mxu2 %v3255_v43  ;;  %v3877_v36 = vld [vmem:[#allocation8 + $0x644] sm:$0xf]  ;;  %v3724_v43 = vld [vmem:[#allocation8 + $0x17c] sm:$0xf]  ;;  %v2896_v35 = vld [vmem:[#allocation8 + $0x2bc] sm:$0xf0] }
  0xab   :  { %v3367_v9 = vor.u32 %v3877_v36, %v3364_v37  ;;  %v2755_v50 = vor.u32 %v3724_v43, %v2752_v44  ;;  %v3832_v36 = vld [vmem:[#allocation8 + $0x4dc] sm:$0xf]  ;;  %v3184_v37 = vld [vmem:[#allocation8 + $0x4fc] sm:$0xf0]  ;;  %v2572_v43 = vld [vmem:[#allocation8 + $0x34] sm:$0xf0] }
  0xac   :  { %2130 = vmatpush.bf16.msra.mxu0 %v2643_v52  ;;  %v3616_v52 = vld [vmem:[#allocation8 + $0x85c] sm:$0xf0] }
  0xad   :  { %2143 = vmatpush.bf16.msra.mxu1 %v2931_v53  ;;  %v3043_v53 = vor.u32 %v3796_v45, %v3040_v46  ;;  %v3619_v62 = vor.u32 %v3940_v51, %v3616_v52  ;;  %v3187_v45 = vor.u32 %v3832_v36, %v3184_v37  ;;  %v3751_v46 = vld [vmem:[#allocation8 + $0x254] sm:$0xf]  ;;  %v2830_v51 = vld [vmem:[#allocation8 + $0x210] sm:$0xf] }
  0xae   :  { %2168 = vmatpush.bf16.msra.mxu3 %v3543_v47  ;;  %2156 = vmatpush.bf16.msra.mxu2 %v3219_v55  ;;  %v3868_v47 = vld [vmem:[#allocation8 + $0x5fc] sm:$0xf]  ;;  %v3715_v55 = vld [vmem:[#allocation8 + $0x134] sm:$0xf] }
  0xaf   :  { %v3331_v54 = vor.u32 %v3868_v47, %v3328_v48  ;;  %v2719_v0 = vor.u32 %v3715_v55, %v2716_v56  ;;  %v2860_v47 = vld [vmem:[#allocation8 + $0x274] sm:$0xf0]  ;;  %v3823_v48 = vld [vmem:[#allocation8 + $0x494] sm:$0xf]  ;;  %v3406_v56 = vld [vmem:[#allocation8 + $0x690] sm:$0xf] }
  0xb0   :  { %2131 = vmatpush.bf16.msra.mxu0 %v2607_v2  ;;  %v3580_v2 = vld [vmem:[#allocation8 + $0x814] sm:$0xf0]  ;;  %v3747_v52 = vld [vmem:[#allocation8 + $0x230] sm:$0xf0] }
  0xb1   :  { %2144 = vmatpush.bf16.msra.mxu1 %v2895_v3  ;;  %v3007_v3 = vor.u32 %v3787_v57, %v3004_v58  ;;  %v3583_v15 = vor.u32 %v3931_v1, %v3580_v2  ;;  %v3819_v55 = vld [vmem:[#allocation8 + $0x470] sm:$0xf0]  ;;  %v2831_v2 = vor.u32 %v3747_v52, %v2830_v51 }
  0xb2   :  { %2169 = vmatpush.bf16.msra.mxu3 %v3507_v59  ;;  %2157 = vmatpush.bf16.msra.mxu2 %v3183_v11  ;;  %v3859_v59 = vld [vmem:[#allocation8 + $0x5b4] sm:$0xf]  ;;  %v3778_v11 = vld [vmem:[#allocation8 + $0x32c] sm:$0xf] }
  0xb3   :  { %v3295_v6 = vor.u32 %v3859_v59, %v3292_v61  ;;  %v2971_v18 = vor.u32 %v3778_v11, %v2968_v12  ;;  %v3891_v58 = vld [vmem:[#allocation8 + $0x6b0] sm:$0xf0]  ;;  %v3436_v61 = vld [vmem:[#allocation8 + $0x6f4] sm:$0xf0] }
  0xb4   :  { %2132 = vmatpush.bf16.msra.mxu0 %v2571_v22  ;;  %v3769_v22 = vld [vmem:[#allocation8 + $0x2e4] sm:$0xf]  ;;  %v3895_v59 = vld [vmem:[#allocation8 + $0x6d4] sm:$0xf]  ;;  %v3407_v11 = vor.u32 %v3891_v58, %v3406_v56 }
  0xb5   :  { %2145 = vmatpush.bf16.msra.mxu1 %v2859_v23  ;;  %v2932_v23 = vld [vmem:[#allocation8 + $0x304] sm:$0xf0]  ;;  %v3439_v12 = vor.u32 %v3895_v59, %v3436_v61  ;;  %v3711_v56 = vld [vmem:[#allocation8 + $0x110] sm:$0xf0] }
  0xb6   :  { %2170 = vmatpush.bf16.msra.mxu3 %v3471_v16  ;;  %2158 = vmatpush.bf16.msra.mxu2 %v3147_v27  ;;  %v2683_v16 = vor.u32 %v3706_v7, %v2680_v8  ;;  %v3547_v27 = vor.u32 %v3922_v10, %v3544_v17  ;;  %v2935_v31 = vor.u32 %v3769_v22, %v2932_v23  ;;  %v3882_v10 = vld [vmem:[#allocation8 + $0x668] sm:$0xf0]  ;;  %v2758_v23 = vld [vmem:[#allocation8 + $0x180] sm:$0xf]  ;;  %v3783_v58 = vld [vmem:[#allocation8 + $0x350] sm:$0xf0] }
  0xb7   :  { %2133 = vmatmul.bf16.vlgmr.msra.gmra.mxu0 %v4196_v4 }
  0xb8   :  { %2177 = vmatpush.bf16.msrb.mxu0 %v2827_v28  ;;  %2146 = vmatmul.bf16.vlgmr.msra.gmra.mxu1 %v4198_v5  ;;  %v2647_v28 = vor.u32 %v3697_v20, %v2644_v21  ;;  %v3954_v20 = vld [vmem:[#allocation8 + $0x8a8] sm:$0xf0] }
  0xb9   :  { %2190 = vmatpush.bf16.msrb.mxu1 %v3115_v24  ;;  %2159 = vmatmul.bf16.vlgmr.msra.gmra.mxu2 %v4192_v60  ;;  %v3508_v24 = vld [vmem:[#allocation8 + $0x784] sm:$0xf0] }
  0xba   :  { %2203 = vmatpush.bf16.msrb.mxu2 %v3403_v30  ;;  %2171 = vmatpush.bf16.msra.mxu3 %v3435_v34  ;;  %v3688_v30 = vld [vmem:[#allocation8 + $0x5c] sm:$0xf] }
  0xbb   :  { %v3760_v34 = vld [vmem:[#allocation8 + $0x29c] sm:$0xf]  ;;  %v2611_v41 = vor.u32 %v3688_v30, %v2608_v33  ;;  %v3873_v33 = vld [vmem:[#allocation8 + $0x620] sm:$0xf0] }
  0xbc   :  { %2178 = vmatpush.bf16.msrb.mxu0 %v2791_v39  ;;  %v3511_v39 = vor.u32 %v3913_v29, %v3508_v24  ;;  %v2899_v44 = vor.u32 %v3760_v34, %v2896_v35  ;;  %v3801_v29 = vld [vmem:[#allocation8 + $0x3e0] sm:$0xf0]  ;;  %v3622_v34 = vld [vmem:[#allocation8 + $0x840] sm:$0xf] }
  0xbd   :  { %2191 = vmatpush.bf16.msrb.mxu1 %v3079_v42  ;;  %3672 = vmatmul.msk.bf16.vlgmr.msra.gmra.mxu3 %vm1885_vm1, %v4194_v63  ;;  %v3472_v42 = vld [vmem:[#allocation8 + $0x73c] sm:$0xf0]  ;;  %v3945_v35 = vld [vmem:[#allocation8 + $0x860] sm:$0xf0] }
  0xbe   :  { %2216 = vmatpush.bf16.msrb.mxu3 %v1906_v38  ;;  %2204 = vmatpush.bf16.msrb.mxu2 %v3367_v9  ;;  %v4237_v38 = vld [vmem:[#allocation8 + $0x8d0] sm:$0x33] }
  0xbf   :  { %v3679_v9 = vld [vmem:[#allocation8 + $0x14] sm:$0xf] }
  0xc0   :  { %2179 = vmatpush.bf16.msrb.mxu0 %v2755_v50  ;;  %v3148_v50 = vld [vmem:[#allocation8 + $0x4b4] sm:$0xf0]  ;;  %v2575_v57 = vor.u32 %v3679_v9, %v2572_v43  ;;  %v3720_v43 = vld [vmem:[#allocation8 + $0x158] sm:$0xf0] }
  0xc1   :  { %2192 = vmatpush.bf16.msrb.mxu1 %v3043_v53  ;;  %v3475_v53 = vor.u32 %v3904_v40, %v3472_v42  ;;  %v1939_v8 = vpop.f32.mrf.mxu1  ;;  %v2722_v40 = vld [vmem:[#allocation8 + $0x138] sm:$0xf] }
  0xc2   :  { %2217 = vmatpush.bf16.msrb.mxu3 %v3655_v49  ;;  %2205 = vmatpush.bf16.msrb.mxu2 %v3331_v54  ;;  %v1315_v49 = vunpack.c.l.b16 %v4237_v38  ;;  %v3118_v54 = vld [vmem:[#allocation8 + $0x450] sm:$0xf]  ;;  %v1926_v7 = vpop.f32.mrf.mxu0  ;;  %v2723_v51 = vor.u32 %v3720_v43, %v2722_v40  ;;  %v2866_v40 = vld [vmem:[#allocation8 + $0x258] sm:$0xf] }
  0xc3   :  { %v1940_v17 = vadd.f32 %v1939_v8, %v1926_v7  ;;  %v2650_v7 = vld [vmem:[#allocation8 + $0xa8] sm:$0xf]  ;;  %v3154_v43 = vld [vmem:[#allocation8 + $0x498] sm:$0xf] }
  0xc4   :  { %2180 = vmatpush.bf16.msrb.mxu0 %v2719_v0  ;;  %v3151_v0 = vor.u32 %v3823_v48, %v3148_v50  ;;  %v1603_v1 = vpack.c.b16 %v1315_v49, %v1315_v49  ;;  %v3864_v48 = vld [vmem:[#allocation8 + $0x5d8] sm:$0xf0]  ;;  %v3586_v49 = vld [vmem:[#allocation8 + $0x7f8] sm:$0xf] }
  0xc5   :  { %2193 = vmatpush.bf16.msrb.mxu1 %v3007_v3  ;;  %v3119_v3 = vor.u32 %v3819_v55, %v3118_v54  ;;  %v3936_v50 = vld [vmem:[#allocation8 + $0x818] sm:$0xf0] }
  0xc6   :  { %2218 = vmatpush.bf16.msrb.mxu3 %v3619_v62  ;;  %2206 = vmatpush.bf16.msrb.mxu2 %v3295_v6  ;;  %v2863_v62 = vor.u32 %v3751_v46, %v2860_v47  ;;  %v2794_v6 = vld [vmem:[#allocation8 + $0x1c8] sm:$0xf]  ;;  %v1952_v26 = vpop.f32.mrf.mxu2  ;;  %v1965_v24 = vpop.f32.mrf.mxu3  ;;  %v3623_v46 = vor.u32 %v3945_v35, %v3622_v34  ;;  %v3298_v47 = vld [vmem:[#allocation8 + $0x5b8] sm:$0xf]  ;;  %v3587_v61 = vor.u32 %v3936_v50, %v3586_v49  ;;  %v3815_v50 = vld [vmem:[#allocation8 + $0x454] sm:$0xf] }
  0xc7   :  { %v2795_v21 = vor.u32 %v3738_v13, %v2794_v6  ;;  %v3299_v54 = vor.u32 %v3864_v48, %v3298_v47  ;;  %v3774_v13 = vld [vmem:[#allocation8 + $0x308] sm:$0xf0]  ;;  %v3743_v48 = vld [vmem:[#allocation8 + $0x214] sm:$0xf]  ;;  %v2832_v49 = vld [vmem:[#allocation8 + $0x234] sm:$0xf0] }
  0xc8   :  { %2181 = vmatpush.bf16.msrb.mxu0 %v2683_v16  ;;  %v3370_v16 = vld [vmem:[#allocation8 + $0x648] sm:$0xf] }
  0xc9   :  { %2194 = vmatpush.bf16.msrb.mxu1 %v2971_v18  ;;  %v1909_v18 = vsel %vm1889_vm0, %v1603_v1, 0  ;;  %v3371_v25 = vor.u32 %v3882_v10, %v3370_v16  ;;  %v1941_v42 = vpop.f32.mrf.mxu1  ;;  %v3550_v1 = vld [vmem:[#allocation8 + $0x7b0] sm:$0xf]  ;;  %v3226_v16 = vld [vmem:[#allocation8 + $0x528] sm:$0xf] }
  0xca   :  { %2219 = vmatpush.bf16.msrb.mxu3 %v3583_v15  ;;  %2207 = vmatpush.bf16.msrb.mxu2 %v3259_v19  ;;  %v3810_v15 = vld [vmem:[#allocation8 + $0x428] sm:$0xf0]  ;;  %v3658_v19 = vld [vmem:[#allocation8 + $0x888] sm:$0xf] }
  0xcb   :  { %v3083_v22 = vor.u32 %v3810_v15, %v3082_v14  ;;  %v3659_v30 = vor.u32 %v3954_v20, %v3658_v19  ;;  %v3846_v10 = vld [vmem:[#allocation8 + $0x548] sm:$0xf0] }
  0xcc   :  { %2182 = vmatpush.bf16.msrb.mxu0 %v2647_v28  ;;  %v3046_v28 = vld [vmem:[#allocation8 + $0x3c0] sm:$0xf]  ;;  %v3918_v19 = vld [vmem:[#allocation8 + $0x788] sm:$0xf0] }
  0xcd   :  { %2195 = vmatpush.bf16.msrb.mxu1 %v2935_v31  ;;  %v1953_v31 = vadd.f32 %v1952_v26, %v1940_v17  ;;  %v3047_v37 = vor.u32 %v3801_v29, %v3046_v28  ;;  %v3693_v26 = vld [vmem:[#allocation8 + $0x80] sm:$0xf0] }
  0xce   :  { %2220 = vmatpush.bf16.msrb.mxu3 %v3547_v27  ;;  %2208 = vmatpush.bf16.msrb.mxu2 %v3223_v32  ;;  %v3729_v27 = vld [vmem:[#allocation8 + $0x1a0] sm:$0xf0]  ;;  %v3334_v32 = vld [vmem:[#allocation8 + $0x600] sm:$0xf]  ;;  %v1954_v55 = vpop.f32.mrf.mxu2  ;;  %v1967_v59 = vpop.f32.mrf.mxu3 }
  0xcf   :  { %v2759_v36 = vor.u32 %v3729_v27, %v2758_v23  ;;  %v3335_v9 = vor.u32 %v3873_v33, %v3334_v32  ;;  %v2614_v23 = vld [vmem:[#allocation8 + $0x60] sm:$0xf]  ;;  %v3765_v28 = vld [vmem:[#allocation8 + $0x2c0] sm:$0xf0]  ;;  %v3408_v55 = vld [vmem:[#allocation8 + $0x6b4] sm:$0xf0] }
  0xd0   :  { %2183 = vmatpush.bf16.msrb.mxu0 %v2611_v41  ;;  %v1928_v41 = vpop.f32.mrf.mxu0  ;;  %v2902_v27 = vld [vmem:[#allocation8 + $0x2a0] sm:$0xf]  ;;  %v3909_v33 = vld [vmem:[#allocation8 + $0x740] sm:$0xf0]  ;;  %v2615_v35 = vor.u32 %v3693_v26, %v2614_v23  ;;  %v3900_v59 = vld [vmem:[#allocation8 + $0x6f8] sm:$0xf0] }
  0xd1   :  { %2196 = vmatpush.bf16.msrb.mxu1 %v2899_v44  ;;  %v3010_v44 = vld [vmem:[#allocation8 + $0x378] sm:$0xf]  ;;  %v3478_v32 = vld [vmem:[#allocation8 + $0x720] sm:$0xf]  ;;  %v3048_v23 = vld [vmem:[#allocation8 + $0x3e4] sm:$0xf0] }
  0xd2   :  { %2221 = vmatpush.bf16.msrb.mxu3 %v3511_v39  ;;  %2209 = vmatpush.bf16.msrb.mxu2 %v3187_v45  ;;  %v1966_v39 = vadd.f32 %v1965_v24, %v1953_v31  ;;  %v3792_v45 = vld [vmem:[#allocation8 + $0x398] sm:$0xf0]  ;;  %v3190_v24 = vld [vmem:[#allocation8 + $0x4e0] sm:$0xf]  ;;  %v3479_v47 = vor.u32 %v3909_v33, %v3478_v32  ;;  %v3336_v26 = vld [vmem:[#allocation8 + $0x624] sm:$0xf0] }
  0xd3   :  { %v3011_v52 = vor.u32 %v3792_v45, %v3010_v44  ;;  %v3828_v44 = vld [vmem:[#allocation8 + $0x4b8] sm:$0xf0]  ;;  %v1316_v45 = vunpack.c.h.b16 %v4237_v38  ;;  %v2724_v33 = vld [vmem:[#allocation8 + $0x15c] sm:$0xf0] }
  0xd4   :  { %2184 = vmatpush.bf16.msrb.mxu0 %v2575_v57  ;;  %2385 = vst [vmem:[#allocation10] sm:$0x3] %v1966_v39  ;;  %v2974_v57 = vld [vmem:[#allocation8 + $0x330] sm:$0xf]  ;;  %v3684_v39 = vld [vmem:[#allocation8 + $0x38] sm:$0xf0]  ;;  %v3155_v38 = vor.u32 %v3828_v44, %v3154_v43 }
  0xd5   :  { %2197 = vmatpush.bf16.msrb.mxu1 %v2863_v62  ;;  %v3262_v62 = vld [vmem:[#allocation8 + $0x570] sm:$0xf]  ;;  %v2975_v6 = vor.u32 %v3783_v58, %v2974_v57  ;;  %v1991_v17 = vpop.f32.mrf.mxu1  ;;  %v3442_v58 = vld [vmem:[#allocation8 + $0x6d8] sm:$0xf]  ;;  %v3716_v32 = vld [vmem:[#allocation8 + $0x13c] sm:$0xf] }
  0xd6   :  { %2222 = vmatpush.bf16.msrb.mxu3 %v3475_v53  ;;  %2210 = vmatpush.bf16.msrb.mxu2 %v3151_v0  ;;  %v2686_v53 = vld [vmem:[#allocation8 + $0xf0] sm:$0xf]  ;;  %v3855_v0 = vld [vmem:[#allocation8 + $0x590] sm:$0xf0]  ;;  %2527 = dma.vmem_to_hbm [thread:$0]  %s2523_s15, 32, %s2525_s13, [#allocation4]  }
  0xd7   :  { %2185 = vmatmul.bf16.vlgmr.msrb.gmra.mxu0 %v4196_v4  ;;  %v3263_v8 = vor.u32 %v3855_v0, %v3262_v62  ;;  %v1604_v62 = vpack.c.b16 %v1316_v45, %v1316_v45  ;;  %v3707_v44 = vld [vmem:[#allocation8 + $0xf4] sm:$0xf]  ;;  %v2688_v45 = vld [vmem:[#allocation8 + $0x114] sm:$0xf0] }
  0xd8   :  { %2229 = vmatpush.bf16.msra.mxu0 %v2831_v2  ;;  %2198 = vmatmul.bf16.vlgmr.msrb.gmra.mxu1 %v4198_v5  ;;  %v3927_v2 = vld [vmem:[#allocation8 + $0x7d0] sm:$0xf0]  ;;  %v1978_v14 = vpop.f32.mrf.mxu0 }
  0xd9   :  { %2242 = vmatpush.bf16.msra.mxu1 %v3119_v3  ;;  %2211 = vmatmul.bf16.vlgmr.msrb.gmra.mxu2 %v4192_v60  ;;  %v2687_v3 = vor.u32 %v3711_v56, %v2686_v53  ;;  %v3551_v15 = vor.u32 %v3927_v2, %v3550_v1  ;;  %v1992_v20 = vadd.f32 %v1991_v17, %v1978_v14  ;;  %v3120_v53 = vld [vmem:[#allocation8 + $0x474] sm:$0xf0]  ;;  %v3734_v2 = vld [vmem:[#allocation8 + $0x1cc] sm:$0xf]  ;;  %v3660_v17 = vld [vmem:[#allocation8 + $0x8ac] sm:$0xf0] }
  0xda   :  { %2255 = vmatpush.bf16.msra.mxu2 %v3407_v11  ;;  %2223 = vmatpush.bf16.msrb.mxu3 %v3439_v12  ;;  %v3702_v11 = vld [vmem:[#allocation8 + $0xc8] sm:$0xf0]  ;;  %v2938_v12 = vld [vmem:[#allocation8 + $0x2e8] sm:$0xf]  ;;  %v3123_v0 = vor.u32 %v3815_v50, %v3120_v53  ;;  %v3264_v50 = vld [vmem:[#allocation8 + $0x594] sm:$0xf0] }
  0xdc   :  { %2230 = vmatpush.bf16.msra.mxu0 %v2795_v21  ;;  %v2651_v21 = vor.u32 %v3702_v11, %v2650_v7  ;;  %v2004_v34 = vpop.f32.mrf.mxu2  ;;  %v3084_v11 = vld [vmem:[#allocation8 + $0x42c] sm:$0xf0] }
  0xdd   :  { %2243 = vmatpush.bf16.msra.mxu1 %v3083_v22  ;;  %3673 = vmatmul.msk.bf16.vlgmr.msrb.gmra.mxu3 %vm1885_vm1, %v4194_v63  ;;  %v2939_v22 = vor.u32 %v3774_v13, %v2938_v12  ;;  %v2005_v41 = vadd.f32 %v2004_v34, %v1992_v20  ;;  %v3878_v12 = vld [vmem:[#allocation8 + $0x64c] sm:$0xf]  ;;  %v3372_v13 = vld [vmem:[#allocation8 + $0x66c] sm:$0xf0]  ;;  %v3725_v20 = vld [vmem:[#allocation8 + $0x184] sm:$0xf] }
  0xde   :  { %2268 = vmatpush.bf16.msra.mxu3 %v1909_v18  ;;  %2256 = vmatpush.bf16.msra.mxu2 %v3371_v25  ;;  %v3514_v18 = vld [vmem:[#allocation8 + $0x768] sm:$0xf]  ;;  %v3227_v25 = vor.u32 %v3846_v10, %v3226_v16  ;;  %v3950_v10 = vld [vmem:[#allocation8 + $0x88c] sm:$0xf]  ;;  %v3788_v34 = vld [vmem:[#allocation8 + $0x37c] sm:$0xf] }
  0xdf   :  { %v3515_v29 = vor.u32 %v3918_v19, %v3514_v18  ;;  %v3375_v19 = vor.u32 %v3878_v12, %v3372_v13 }
  0xe0   :  { %2231 = vmatpush.bf16.msra.mxu0 %v2759_v36  ;;  %v2017_v31 = vpop.f32.mrf.mxu3  ;;  %v2903_v36 = vor.u32 %v3765_v28, %v2902_v27  ;;  %v3663_v27 = vor.u32 %v3950_v10, %v3660_v17  ;;  %v2904_v10 = vld [vmem:[#allocation8 + $0x2c4] sm:$0xf0] }
  0xe1   :  { %2244 = vmatpush.bf16.msra.mxu1 %v3047_v37  ;;  %v2578_v37 = vld [vmem:[#allocation8 + $0x18] sm:$0xf] }
  0xe2   :  { %2269 = vmatpush.bf16.msra.mxu3 %v3659_v30  ;;  %2257 = vmatpush.bf16.msra.mxu2 %v3335_v9  ;;  %v3837_v30 = vld [vmem:[#allocation8 + $0x500] sm:$0xf0]  ;;  %v3756_v9 = vld [vmem:[#allocation8 + $0x278] sm:$0xf0]  ;;  %v2579_v56 = vor.u32 %v3684_v39, %v2578_v37  ;;  %v3300_v37 = vld [vmem:[#allocation8 + $0x5dc] sm:$0xf0] }
  0xe3   :  { %v3191_v42 = vor.u32 %v3837_v30, %v3190_v24  ;;  %v2867_v57 = vor.u32 %v3756_v9, %v2866_v40  ;;  %v3624_v24 = vld [vmem:[#allocation8 + $0x864] sm:$0xf0]  ;;  %v2727_v40 = vor.u32 %v3716_v32, %v2724_v33  ;;  %v3752_v33 = vld [vmem:[#allocation8 + $0x25c] sm:$0xf] }
  0xe4   :  { %2232 = vmatpush.bf16.msra.mxu0 %v2723_v51  ;;  %v4247_v51 = vadd.f32 %v2017_v31, %v2005_v41  ;;  %v2006_v14 = vpop.f32.mrf.mxu2  ;;  %v3932_v41 = vld [vmem:[#allocation8 + $0x7fc] sm:$0xf] }
  0xe5   :  { %2245 = vmatpush.bf16.msra.mxu1 %v3011_v52  ;;  %v1993_v52 = vpop.f32.mrf.mxu1 }
  0xe6   :  { %2270 = vmatpush.bf16.msra.mxu3 %v3623_v46  ;;  %2258 = vmatpush.bf16.msra.mxu2 %v3299_v54  ;;  %v1980_v46 = vpop.f32.mrf.mxu0  ;;  %v3887_v54 = vld [vmem:[#allocation8 + $0x694] sm:$0xf] }
  0xe7   :  { %v3411_v1 = vor.u32 %v3887_v54, %v3408_v55  ;;  %v3779_v46 = vld [vmem:[#allocation8 + $0x334] sm:$0xf]  ;;  %v2691_v54 = vor.u32 %v3707_v44, %v2688_v45  ;;  %v3892_v45 = vld [vmem:[#allocation8 + $0x6b8] sm:$0xf0] }
  0xe8   :  { %2233 = vmatpush.bf16.msra.mxu0 %v2687_v3  ;;  %v2796_v3 = vld [vmem:[#allocation8 + $0x1ec] sm:$0xf0]  ;;  %v2019_v7 = vpop.f32.mrf.mxu3  ;;  %v3923_v55 = vld [vmem:[#allocation8 + $0x7b4] sm:$0xf] }
  0xe9   :  { %2246 = vmatpush.bf16.msra.mxu1 %v2975_v6  ;;  %v3806_v6 = vld [vmem:[#allocation8 + $0x40c] sm:$0xf]  ;;  %v2799_v16 = vor.u32 %v3734_v2, %v2796_v3  ;;  %v3228_v2 = vld [vmem:[#allocation8 + $0x54c] sm:$0xf0] }
  0xea   :  { %2271 = vmatpush.bf16.msra.mxu3 %v3587_v61  ;;  %2259 = vmatpush.bf16.msra.mxu2 %v3263_v8  ;;  %v2835_v61 = vor.u32 %v3743_v48, %v2832_v49  ;;  %v3443_v8 = vor.u32 %v3900_v59, %v3442_v58  ;;  %v3087_v18 = vor.u32 %v3806_v6, %v3084_v11  ;;  %v2976_v48 = vld [vmem:[#allocation8 + $0x354] sm:$0xf0]  ;;  %v3851_v49 = vld [vmem:[#allocation8 + $0x574] sm:$0xf]  ;;  %v3914_v7 = vld [vmem:[#allocation8 + $0x76c] sm:$0xf] }
  0xeb   :  { %v2979_v58 = vor.u32 %v3779_v46, %v2976_v48  ;;  %v3267_v59 = vor.u32 %v3851_v49, %v3264_v50  ;;  %v3689_v11 = vld [vmem:[#allocation8 + $0x64] sm:$0xf]  ;;  %v3896_v46 = vld [vmem:[#allocation8 + $0x6dc] sm:$0xf] }
  0xec   :  { %2234 = vmatpush.bf16.msra.mxu0 %v2651_v21  ;;  %v2760_v21 = vld [vmem:[#allocation8 + $0x1a4] sm:$0xf0] }
  0xed   :  { %2247 = vmatpush.bf16.msra.mxu1 %v2939_v22  ;;  %v3797_v22 = vld [vmem:[#allocation8 + $0x3c4] sm:$0xf]  ;;  %v2763_v28 = vor.u32 %v3725_v20, %v2760_v21  ;;  %v3192_v20 = vld [vmem:[#allocation8 + $0x504] sm:$0xf0]  ;;  %v435_v21 = vld [vmem:[#allocation8 + $0x8d8] sm:$0x3] }
  0xee   :  { %2272 = vmatpush.bf16.msra.mxu3 %v3551_v15  ;;  %2260 = vmatpush.bf16.msra.mxu2 %v3227_v25  ;;  %v1912_v15 = vsel %vm1889_vm0, %v1604_v62, 0  ;;  %v3869_v25 = vld [vmem:[#allocation8 + $0x604] sm:$0xf]  ;;  %v3051_v30 = vor.u32 %v3797_v22, %v3048_v23  ;;  %v3770_v62 = vld [vmem:[#allocation8 + $0x2ec] sm:$0xf] }
  0xef   :  { %v3339_v31 = vor.u32 %v3869_v25, %v3336_v26  ;;  %v3905_v23 = vld [vmem:[#allocation8 + $0x724] sm:$0xf] }
  0xf0   :  { %2235 = vmatpush.bf16.msra.mxu0 %v2615_v35  ;;  %v3012_v35 = vld [vmem:[#allocation8 + $0x39c] sm:$0xf0] }
  0xf1   :  { %2248 = vmatpush.bf16.msra.mxu1 %v2903_v36  ;;  %v3860_v36 = vld [vmem:[#allocation8 + $0x5bc] sm:$0xf]  ;;  %v3015_v9 = vor.u32 %v3788_v34, %v3012_v35  ;;  %v2868_v34 = vld [vmem:[#allocation8 + $0x27c] sm:$0xf0] }
  0xf2   :  { %2273 = vmatpush.bf16.msra.mxu3 %v3515_v29  ;;  %2261 = vmatpush.bf16.msra.mxu2 %v3191_v42  ;;  %v3941_v29 = vld [vmem:[#allocation8 + $0x844] sm:$0xf]  ;;  %v3588_v42 = vld [vmem:[#allocation8 + $0x81c] sm:$0xf0]  ;;  %v3303_v43 = vor.u32 %v3860_v36, %v3300_v37  ;;  %v3824_v35 = vld [vmem:[#allocation8 + $0x49c] sm:$0xf]  ;;  %v1317_v36 = vunpack.c.l.b16 %v435_v21  ;;  %v2871_v49 = vor.u32 %v3752_v33, %v2868_v34 }
  0xf3   :  { %v3627_v39 = vor.u32 %v3941_v29, %v3624_v24  ;;  %v3591_v52 = vor.u32 %v3932_v41, %v3588_v42  ;;  %v3680_v29 = vld [vmem:[#allocation8 + $0x1c] sm:$0xf]  ;;  %v2580_v24 = vld [vmem:[#allocation8 + $0x3c] sm:$0xf0]  ;;  %v3126_v42 = vld [vmem:[#allocation8 + $0x458] sm:$0xf] }
  0xf4   :  { %2236 = vmatpush.bf16.msra.mxu0 %v2579_v56  ;;  %v3552_v56 = vld [vmem:[#allocation8 + $0x7d4] sm:$0xf0]  ;;  %v3156_v37 = vld [vmem:[#allocation8 + $0x4bc] sm:$0xf0]  ;;  %v2583_v44 = vor.u32 %v3680_v29, %v2580_v24  ;;  %v3865_v29 = vld [vmem:[#allocation8 + $0x5e0] sm:$0xf0] }
  0xf5   :  { %2249 = vmatpush.bf16.msra.mxu1 %v2867_v57  ;;  %v2043_v53 = vpop.f32.mrf.mxu1  ;;  %v3555_v3 = vor.u32 %v3923_v55, %v3552_v56  ;;  %v3159_v50 = vor.u32 %v3824_v35, %v3156_v37  ;;  %v2802_v55 = vld [vmem:[#allocation8 + $0x1d0] sm:$0xf]  ;;  %v2730_v21 = vld [vmem:[#allocation8 + $0x140] sm:$0xf]  ;;  %v2694_v34 = vld [vmem:[#allocation8 + $0xf8] sm:$0xf] }
  0xf6   :  { %2274 = vmatpush.bf16.msra.mxu3 %v3479_v47  ;;  %2262 = vmatpush.bf16.msra.mxu2 %v3155_v38  ;;  %v2030_v47 = vpop.f32.mrf.mxu0  ;;  %v3698_v38 = vld [vmem:[#allocation8 + $0xac] sm:$0xf]  ;;  %v3594_v24 = vld [vmem:[#allocation8 + $0x800] sm:$0xf]  ;;  %v2982_v37 = vld [vmem:[#allocation8 + $0x338] sm:$0xf] }
  0xf7   :  { %2237 = vmatmul.bf16.vlgmr.msra.gmra.mxu0 %v4196_v4  ;;  %v2044_v57 = vadd.f32 %v2043_v53, %v2030_v47  ;;  %v3444_v47 = vld [vmem:[#allocation8 + $0x6fc] sm:$0xf0] }
  0xf8   :  { %2281 = vmatpush.bf16.msrb.mxu0 %v2835_v61  ;;  %2250 = vmatmul.bf16.vlgmr.msra.gmra.mxu1 %v4198_v5  ;;  %v2652_v61 = vld [vmem:[#allocation8 + $0xcc] sm:$0xf0] }
  0xf9   :  { %2294 = vmatpush.bf16.msrb.mxu1 %v3123_v0  ;;  %2263 = vmatmul.bf16.vlgmr.msra.gmra.mxu2 %v4192_v60  ;;  %v2940_v0 = vld [vmem:[#allocation8 + $0x30c] sm:$0xf0]  ;;  %v2655_v6 = vor.u32 %v3698_v38, %v2652_v61  ;;  %v3811_v38 = vld [vmem:[#allocation8 + $0x430] sm:$0xf0] }
  0xfa   :  { %2307 = vmatpush.bf16.msrb.mxu2 %v3411_v1  ;;  %2275 = vmatpush.bf16.msra.mxu3 %v3443_v8  ;;  %v3842_v1 = vld [vmem:[#allocation8 + $0x52c] sm:$0xf]  ;;  %v3516_v8 = vld [vmem:[#allocation8 + $0x78c] sm:$0xf0]  ;;  %v2943_v13 = vor.u32 %v3770_v62, %v2940_v0  ;;  %v3883_v0 = vld [vmem:[#allocation8 + $0x670] sm:$0xf0] }
  0xfb   :  { %v3231_v14 = vor.u32 %v3842_v1, %v3228_v2  ;;  %v3519_v22 = vor.u32 %v3914_v7, %v3516_v8  ;;  %v3378_v62 = vld [vmem:[#allocation8 + $0x650] sm:$0xf]  ;;  %v2766_v8 = vld [vmem:[#allocation8 + $0x188] sm:$0xf] }
  0xfc   :  { %2282 = vmatpush.bf16.msrb.mxu0 %v2799_v16  ;;  %v2056_v12 = vpop.f32.mrf.mxu2  ;;  %v3761_v16 = vld [vmem:[#allocation8 + $0x2a4] sm:$0xf]  ;;  %v3666_v2 = vld [vmem:[#allocation8 + $0x890] sm:$0xf] }
  0xfd   :  { %2295 = vmatpush.bf16.msrb.mxu1 %v3087_v18  ;;  %3674 = vmatmul.msk.bf16.vlgmr.msra.gmra.mxu3 %vm1885_vm1, %v4194_v63  ;;  %v2057_v17 = vadd.f32 %v2056_v12, %v2044_v57  ;;  %v2045_v26 = vpop.f32.mrf.mxu1  ;;  %v3447_v57 = vor.u32 %v3896_v46, %v3444_v47  ;;  %v3730_v12 = vld [vmem:[#allocation8 + $0x1a8] sm:$0xf0] }
  0xfe   :  { %2320 = vmatpush.bf16.msrb.mxu3 %v1912_v15  ;;  %2308 = vmatpush.bf16.msrb.mxu2 %v3375_v19  ;;  %v2616_v15 = vld [vmem:[#allocation8 + $0x84] sm:$0xf0]  ;;  %v2032_v18 = vpop.f32.mrf.mxu0  ;;  %v3833_v19 = vld [vmem:[#allocation8 + $0x4e4] sm:$0xf] }
  0xff   :  { %v3195_v32 = vor.u32 %v3833_v19, %v3192_v20  ;;  %v3946_v18 = vld [vmem:[#allocation8 + $0x868] sm:$0xf0]  ;;  %v2767_v19 = vor.u32 %v3730_v12, %v2766_v8  ;;  %v3793_v26 = vld [vmem:[#allocation8 + $0x3a0] sm:$0xf0] }
 0x100   :  { %2283 = vmatpush.bf16.msrb.mxu0 %v2763_v28  ;;  %v2069_v25 = vpop.f32.mrf.mxu3  ;;  %v3480_v28 = vld [vmem:[#allocation8 + $0x744] sm:$0xf0]  ;;  %v3838_v12 = vld [vmem:[#allocation8 + $0x508] sm:$0xf0] }
 0x101   :  { %2296 = vmatpush.bf16.msrb.mxu1 %v3051_v30  ;;  %v4255_v30 = vadd.f32 %v2069_v25, %v2057_v17  ;;  %v3483_v41 = vor.u32 %v3905_v23, %v3480_v28  ;;  %v3630_v17 = vld [vmem:[#allocation8 + $0x848] sm:$0xf]  ;;  %v3721_v23 = vld [vmem:[#allocation8 + $0x160] sm:$0xf0]  ;;  %v3018_v25 = vld [vmem:[#allocation8 + $0x380] sm:$0xf] }
 0x102   :  { %2321 = vmatpush.bf16.msrb.mxu3 %v3663_v27  ;;  %2309 = vmatpush.bf16.msrb.mxu2 %v3339_v31  ;;  %v2619_v27 = vor.u32 %v3689_v11, %v2616_v15  ;;  %v2907_v31 = vor.u32 %v3761_v16, %v2904_v10  ;;  %v3379_v11 = vor.u32 %v3883_v0, %v3378_v62  ;;  %v3342_v16 = vld [vmem:[#allocation8 + $0x608] sm:$0xf]  ;;  %v3874_v10 = vld [vmem:[#allocation8 + $0x628] sm:$0xf0]  ;;  %v3306_v28 = vld [vmem:[#allocation8 + $0x5c0] sm:$0xf] }
 0x103   :  { %v3019_v33 = vor.u32 %v3793_v26, %v3018_v25  ;;  %v3307_v35 = vor.u32 %v3865_v29, %v3306_v28  ;;  %v2622_v0 = vld [vmem:[#allocation8 + $0x68] sm:$0xf]  ;;  %v3757_v25 = vld [vmem:[#allocation8 + $0x280] sm:$0xf0]  ;;  %v3450_v29 = vld [vmem:[#allocation8 + $0x6e0] sm:$0xf] }
 0x104   :  { %2284 = vmatpush.bf16.msrb.mxu0 %v2727_v40  ;;  %v3748_v40 = vld [vmem:[#allocation8 + $0x238] sm:$0xf0]  ;;  %v2058_v48 = vpop.f32.mrf.mxu2  ;;  %v3829_v28 = vld [vmem:[#allocation8 + $0x4c0] sm:$0xf0] }
 0x105   :  { %2297 = vmatpush.bf16.msrb.mxu1 %v3015_v9  ;;  %v3820_v9 = vld [vmem:[#allocation8 + $0x478] sm:$0xf0] }
 0x106   :  { %2322 = vmatpush.bf16.msrb.mxu3 %v3627_v39  ;;  %2310 = vmatpush.bf16.msrb.mxu2 %v3303_v43  ;;  %v2838_v39 = vld [vmem:[#allocation8 + $0x218] sm:$0xf] }
 0x107   :  { %v3414_v43 = vld [vmem:[#allocation8 + $0x698] sm:$0xf]  ;;  %v2839_v53 = vor.u32 %v3748_v40, %v2838_v39  ;;  %v3784_v39 = vld [vmem:[#allocation8 + $0x358] sm:$0xf0] }
 0x108   :  { %2285 = vmatpush.bf16.msrb.mxu0 %v2691_v54  ;;  %v3127_v54 = vor.u32 %v3820_v9, %v3126_v42  ;;  %v3415_v56 = vor.u32 %v3892_v45, %v3414_v43  ;;  %v2071_v61 = vpop.f32.mrf.mxu3  ;;  %v3856_v42 = vld [vmem:[#allocation8 + $0x598] sm:$0xf0]  ;;  %v2983_v48 = vor.u32 %v3784_v39, %v2982_v37 }
 0x109   :  { %2298 = vmatpush.bf16.msrb.mxu1 %v2979_v58  ;;  %v3739_v58 = vld [vmem:[#allocation8 + $0x1f0] sm:$0xf0]  ;;  %v3928_v45 = vld [vmem:[#allocation8 + $0x7d8] sm:$0xf0] }
 0x10a   :  { %2323 = vmatpush.bf16.msrb.mxu3 %v3591_v52  ;;  %2311 = vmatpush.bf16.msrb.mxu2 %v3267_v59  ;;  %v1605_v52 = vpack.c.b16 %v1317_v36, %v1317_v36  ;;  %v3090_v59 = vld [vmem:[#allocation8 + $0x410] sm:$0xf]  ;;  %v3712_v36 = vld [vmem:[#allocation8 + $0x118] sm:$0xf0] }
 0x10b   :  { %v3091_v7 = vor.u32 %v3811_v38, %v3090_v59  ;;  %v2695_v47 = vor.u32 %v3712_v36, %v2694_v34  ;;  %v3919_v59 = vld [vmem:[#allocation8 + $0x790] sm:$0xf0] }
 0x10c   :  { %2286 = vmatpush.bf16.msrb.mxu0 %v2655_v6  ;;  %v1915_v1 = vsel %vm1889_vm0, %v1605_v52, 0  ;;  %v2803_v6 = vor.u32 %v3739_v58, %v2802_v55  ;;  %v3703_v52 = vld [vmem:[#allocation8 + $0xd0] sm:$0xf0]  ;;  %v3522_v58 = vld [vmem:[#allocation8 + $0x770] sm:$0xf] }
 0x10d   :  { %2299 = vmatpush.bf16.msrb.mxu1 %v2943_v13  ;;  %v3054_v13 = vld [vmem:[#allocation8 + $0x3c8] sm:$0xf]  ;;  %v3523_v8 = vor.u32 %v3919_v59, %v3522_v58 }
 0x10e   :  { %2324 = vmatpush.bf16.msrb.mxu3 %v3555_v3  ;;  %2312 = vmatpush.bf16.msrb.mxu2 %v3231_v14  ;;  %v3955_v3 = vld [vmem:[#allocation8 + $0x8b0] sm:$0xf0]  ;;  %v3802_v14 = vld [vmem:[#allocation8 + $0x3e8] sm:$0xf0] }
 0x10f   :  { %v3667_v15 = vor.u32 %v3955_v3, %v3666_v2  ;;  %v3055_v20 = vor.u32 %v3802_v14, %v3054_v13  ;;  %v3694_v3 = vld [vmem:[#allocation8 + $0x88] sm:$0xf0] }
 0x110   :  { %2287 = vmatpush.bf16.msrb.mxu0 %v2619_v27  ;;  %v3631_v27 = vor.u32 %v3946_v18, %v3630_v17  ;;  %v2623_v18 = vor.u32 %v3694_v3, %v2622_v0 }
 0x111   :  { %2300 = vmatpush.bf16.msrb.mxu1 %v2907_v31  ;;  %v3937_v31 = vld [vmem:[#allocation8 + $0x820] sm:$0xf0] }
 0x112   :  { %2325 = vmatpush.bf16.msrb.mxu3 %v3519_v22  ;;  %2313 = vmatpush.bf16.msrb.mxu2 %v3195_v32  ;;  %v3343_v22 = vor.u32 %v3874_v10, %v3342_v16  ;;  %v2731_v32 = vor.u32 %v3721_v23, %v2730_v21  ;;  %v3595_v40 = vor.u32 %v3937_v31, %v3594_v24  ;;  %v3910_v16 = vld [vmem:[#allocation8 + $0x748] sm:$0xf0]  ;;  %v2874_v23 = vld [vmem:[#allocation8 + $0x260] sm:$0xf]  ;;  %v3901_v24 = vld [vmem:[#allocation8 + $0x700] sm:$0xf0] }
 0x114   :  { %2288 = vmatpush.bf16.msrb.mxu0 %v2583_v44  ;;  %v2082_v9 = vpop.f32.mrf.mxu0  ;;  %v3558_v44 = vld [vmem:[#allocation8 + $0x7b8] sm:$0xf] }
 0x115   :  { %2301 = vmatpush.bf16.msrb.mxu1 %v2871_v49  ;;  %v2095_v43 = vpop.f32.mrf.mxu1  ;;  %v2658_v49 = vld [vmem:[#allocation8 + $0xb0] sm:$0xf]  ;;  %v3559_v55 = vor.u32 %v3928_v45, %v3558_v44 }
 0x116   :  { %2326 = vmatpush.bf16.msrb.mxu3 %v3483_v41  ;;  %2314 = vmatpush.bf16.msrb.mxu2 %v3159_v50  ;;  %v3270_v41 = vld [vmem:[#allocation8 + $0x578] sm:$0xf]  ;;  %v2096_v46 = vadd.f32 %v2095_v43, %v2082_v9  ;;  %v2659_v61 = vor.u32 %v3703_v52, %v2658_v49 }
 0x117   :  { %2289 = vmatmul.bf16.vlgmr.msrb.gmra.mxu0 %v4196_v4  ;;  %v3271_v50 = vor.u32 %v3856_v42, %v3270_v41 }
 0x118   :  { %2333 = vmatpush.bf16.msra.mxu0 %v2839_v53  ;;  %2302 = vmatmul.bf16.vlgmr.msrb.gmra.mxu1 %v4198_v5  ;;  %v2946_v53 = vld [vmem:[#allocation8 + $0x2f0] sm:$0xf] }
 0x119   :  { %2346 = vmatpush.bf16.msra.mxu1 %v3127_v54  ;;  %2315 = vmatmul.bf16.vlgmr.msrb.gmra.mxu2 %v4192_v60  ;;  %v3775_v54 = vld [vmem:[#allocation8 + $0x310] sm:$0xf0] }
 0x11a   :  { %2359 = vmatpush.bf16.msra.mxu2 %v3415_v56  ;;  %2327 = vmatpush.bf16.msrb.mxu3 %v3447_v57  ;;  %v3234_v56 = vld [vmem:[#allocation8 + $0x530] sm:$0xf]  ;;  %v3847_v57 = vld [vmem:[#allocation8 + $0x550] sm:$0xf0]  ;;  %v2947_v62 = vor.u32 %v3775_v54, %v2946_v53 }
 0x11b   :  { %v3235_v2 = vor.u32 %v3847_v57, %v3234_v56 }
 0x11c   :  { %2334 = vmatpush.bf16.msra.mxu0 %v2803_v6  ;;  %v2108_v38 = vpop.f32.mrf.mxu2  ;;  %v2910_v6 = vld [vmem:[#allocation8 + $0x2a8] sm:$0xf]  ;;  %v2084_v14 = vpop.f32.mrf.mxu0 }
 0x11d   :  { %2347 = vmatpush.bf16.msra.mxu1 %v3091_v7  ;;  %3675 = vmatmul.msk.bf16.vlgmr.msrb.gmra.mxu3 %vm1885_vm1, %v4194_v63  ;;  %v3766_v7 = vld [vmem:[#allocation8 + $0x2c8] sm:$0xf0]  ;;  %v2097_v17 = vpop.f32.mrf.mxu1  ;;  %v2386_v14 = vlaneseq }
 0x11e   :  { %2372 = vmatpush.bf16.msra.mxu3 %v1915_v1  ;;  %2360 = vmatpush.bf16.msra.mxu2 %v3379_v11  ;;  %v2109_v1 = vadd.f32 %v2108_v38, %v2096_v46  ;;  %v3198_v11 = vld [vmem:[#allocation8 + $0x4e8] sm:$0xf] }
 0x11f   :  { %v3199_v21 = vor.u32 %v3838_v12, %v3198_v11 }
 0x120   :  { %2335 = vmatpush.bf16.msra.mxu0 %v2767_v19  ;;  %v2121_v13 = vpop.f32.mrf.mxu3  ;;  %v2911_v19 = vor.u32 %v3766_v7, %v2910_v6 }
 0x121   :  { %2348 = vmatpush.bf16.msra.mxu1 %v3055_v20  ;;  %v4263_v10 = vadd.f32 %v2121_v13, %v2109_v1  ;;  %v2586_v20 = vld [vmem:[#allocation8 + $0x20] sm:$0xf] }
 0x122   :  { %2373 = vmatpush.bf16.msra.mxu3 %v3667_v15  ;;  %2361 = vmatpush.bf16.msra.mxu2 %v3343_v22  ;;  %v3486_v15 = vld [vmem:[#allocation8 + $0x728] sm:$0xf]  ;;  %v3685_v22 = vld [vmem:[#allocation8 + $0x40] sm:$0xf0] }
 0x123   :  { %v3487_v26 = vor.u32 %v3910_v16, %v3486_v15 }
 0x124   :  { %2336 = vmatpush.bf16.msra.mxu0 %v2731_v32  ;;  %v2110_v31 = vpop.f32.mrf.mxu2  ;;  %v2587_v32 = vor.u32 %v3685_v22, %v2586_v20 }
 0x125   :  { %2349 = vmatpush.bf16.msra.mxu1 %v3019_v33  ;;  %v2875_v33 = vor.u32 %v3757_v25, %v2874_v23 }
 0x126   :  { %2374 = vmatpush.bf16.msra.mxu3 %v3631_v27  ;;  %2362 = vmatpush.bf16.msra.mxu2 %v3307_v35  ;;  %v3162_v27 = vld [vmem:[#allocation8 + $0x4a0] sm:$0xf]  ;;  %v3451_v35 = vor.u32 %v3901_v24, %v3450_v29 }
 0x127   :  { %v3163_v34 = vor.u32 %v3829_v28, %v3162_v27 }
 0x128   :  { %2337 = vmatpush.bf16.msra.mxu0 %v2695_v47  ;;  %v2123_v36 = vpop.f32.mrf.mxu3 }
 0x129   :  { %2350 = vmatpush.bf16.msra.mxu1 %v2983_v48 }
 0x12a   :  { %2375 = vmatpush.bf16.msra.mxu3 %v3595_v40  ;;  %2363 = vmatpush.bf16.msra.mxu2 %v3271_v50 }
 0x12c   :  { %2338 = vmatpush.bf16.msra.mxu0 %v2659_v61 }
 0x12d   :  { %2351 = vmatpush.bf16.msra.mxu1 %v2947_v62 }
 0x12e   :  { %2376 = vmatpush.bf16.msra.mxu3 %v3559_v55  ;;  %2364 = vmatpush.bf16.msra.mxu2 %v3235_v2 }
 0x130   :  { %2339 = vmatpush.bf16.msra.mxu0 %v2623_v18 }
 0x131   :  { %2352 = vmatpush.bf16.msra.mxu1 %v2911_v19  ;;  %v2387_v19 = vand.u32 127, %v2386_v14 }
 0x132   :  { %2377 = vmatpush.bf16.msra.mxu3 %v3523_v8  ;;  %2365 = vmatpush.bf16.msra.mxu2 %v3199_v21 }
 0x133   :  { %v2394_v23 = vadd.s32 896, %v2387_v19 }
 0x134   :  { %2340 = vmatpush.bf16.msra.mxu0 %v2587_v32  ;;  %v2134_v37 = vpop.f32.mrf.mxu0 }
 0x135   :  { %2353 = vmatpush.bf16.msra.mxu1 %v2875_v33  ;;  %v2147_v39 = vpop.f32.mrf.mxu1  ;;  %vm2402_vm2 = vcmp.lt.s32.totalorder %v2394_v23, 1000  ;;  %v2412_v33 = vsel %vm1889_vm0, %v4255_v30, -inf }
 0x136   :  { %2378 = vmatpush.bf16.msra.mxu3 %v3487_v26  ;;  %2366 = vmatpush.bf16.msra.mxu2 %v3163_v34  ;;  %v2148_v40 = vadd.f32 %v2147_v39, %v2134_v37  ;;  %v2411_v39 = vsel %vm1889_vm0, %v4247_v51, -inf }
 0x137   :  { %2341 = vmatmul.bf16.vlgmr.msra.gmra.mxu0 %v4196_v4 }
 0x138   :  { %2354 = vmatmul.bf16.vlgmr.msra.gmra.mxu1 %v4198_v5 }
 0x139   :  { %2367 = vmatmul.bf16.vlgmr.msra.gmra.mxu2 %v4192_v60 }
 0x13a   :  { %2379 = vmatpush.bf16.msra.mxu3 %v3451_v35 }
 0x13c   :  { %v2160_v41 = vpop.f32.mrf.mxu2  ;;  %v2136_v9 = vpop.f32.mrf.mxu0 }
 0x13d   :  { %3676 = vmatmul.msk.bf16.vlgmr.msra.gmra.mxu3 %vm1885_vm1, %v4194_v63  ;;  %v2161_v42 = vadd.f32 %v2160_v41, %v2148_v40  ;;  %v2149_v44 = vpop.f32.mrf.mxu1  ;;  %v2413_v40 = vsel %vm1889_vm0, %v4263_v10, -inf }
 0x140   :  { %v2173_v43 = vpop.f32.mrf.mxu3 }
 0x141   :  { %v4270_v45 = vadd.f32 %v2173_v43, %v2161_v42 }
 0x143   :  { %v2414_v41 = vsel %vm1889_vm0, %v4270_v45, -inf }
 0x144   :  { %v2162_v46 = vpop.f32.mrf.mxu2 }
 0x148   :  { %v2175_v47 = vpop.f32.mrf.mxu3 }
 0x154   :  { %v2186_v4 = vpop.f32.mrf.mxu0 }
 0x155   :  { %v2199_v48 = vpop.f32.mrf.mxu1 }
 0x156   :  { %v2200_v5 = vadd.f32 %v2199_v48, %v2186_v4 }
 0x15c   :  { %v2212_v49 = vpop.f32.mrf.mxu2  ;;  %v2188_v52 = vpop.f32.mrf.mxu0 }
 0x15d   :  { %v2213_v60 = vadd.f32 %v2212_v49, %v2200_v5  ;;  %v2201_v53 = vpop.f32.mrf.mxu1 }
 0x160   :  { %v2225_v50 = vpop.f32.mrf.mxu3 }
 0x161   :  { %v4272_v63 = vadd.f32 %v2225_v50, %v2213_v60 }
 0x163   :  { %v2415_v34 = vsel %vm1889_vm0, %v4272_v63, -inf }
 0x164   :  { %v2214_v54 = vpop.f32.mrf.mxu2  ;;  %v2416_v9 = vmax.f32 %v2411_v39, %v2415_v34 }
 0x168   :  { %v2227_v55 = vpop.f32.mrf.mxu3 }
 0x174   :  { %v2238_v56 = vpop.f32.mrf.mxu0 }
 0x175   :  { %v2251_v57 = vpop.f32.mrf.mxu1 }
 0x176   :  { %v2252_v13 = vadd.f32 %v2251_v57, %v2238_v56 }
 0x17c   :  { %v2264_v58 = vpop.f32.mrf.mxu2  ;;  %v2240_v59 = vpop.f32.mrf.mxu0 }
 0x17d   :  { %v2253_v61 = vpop.f32.mrf.mxu1  ;;  %v2265_v18 = vadd.f32 %v2264_v58, %v2252_v13 }
 0x180   :  { %v2277_v38 = vpop.f32.mrf.mxu3 }
 0x181   :  { %v2278_v22 = vadd.f32 %v2277_v38, %v2265_v18 }
 0x183   :  { %v2417_v24 = vsel %vm1889_vm0, %v2278_v22, -inf }
 0x184   :  { %v2266_v62 = vpop.f32.mrf.mxu2  ;;  %v2418_v36 = vmax.f32 %v2412_v33, %v2417_v24 }
 0x186   :  { %v2423_v47 = vmax.f32 %v2416_v9, %v2418_v36 }
 0x188   :  { %v2279_v0 = vpop.f32.mrf.mxu3 }
 0x194   :  { %v2290_v1 = vpop.f32.mrf.mxu0 }
 0x195   :  { %v2303_v2 = vpop.f32.mrf.mxu1 }
 0x196   :  { %v2304_v15 = vadd.f32 %v2303_v2, %v2290_v1 }
 0x19c   :  { %v2316_v3 = vpop.f32.mrf.mxu2  ;;  %v2292_v7 = vpop.f32.mrf.mxu0 }
 0x19d   :  { %v2305_v8 = vpop.f32.mrf.mxu1  ;;  %v2317_v20 = vadd.f32 %v2316_v3, %v2304_v15 }
 0x1a0   :  { %v2329_v6 = vpop.f32.mrf.mxu3 }
 0x1a1   :  { %v2330_v25 = vadd.f32 %v2329_v6, %v2317_v20 }
 0x1a3   :  { %v2419_v35 = vsel %vm1889_vm0, %v2330_v25, -inf }
 0x1a4   :  { %v2318_v11 = vpop.f32.mrf.mxu2  ;;  %v2420_v43 = vmax.f32 %v2413_v40, %v2419_v35 }
 0x1a8   :  { %v2331_v12 = vpop.f32.mrf.mxu3 }
 0x1b4   :  { %v2342_v16 = vpop.f32.mrf.mxu0 }
 0x1b5   :  { %v2355_v17 = vpop.f32.mrf.mxu1 }
 0x1b6   :  { %v2356_v21 = vadd.f32 %v2355_v17, %v2342_v16 }
 0x1bc   :  { %v2368_v26 = vpop.f32.mrf.mxu2  ;;  %v2344_v28 = vpop.f32.mrf.mxu0 }
 0x1bd   :  { %v2369_v27 = vadd.f32 %v2368_v26, %v2356_v21  ;;  %v2357_v29 = vpop.f32.mrf.mxu1 }
 0x1c0   :  { %v2381_v31 = vpop.f32.mrf.mxu3 }
 0x1c1   :  { %v2382_v32 = vadd.f32 %v2381_v31, %v2369_v27 }
 0x1c3   :  { %v2410_v37 = vsel %vm2402_vm2, %v2382_v32, -inf }
 0x1c4   :  { %v2421_v42 = vsel %vm1889_vm0, %v2410_v37, -inf  ;;  %v2370_v46 = vpop.f32.mrf.mxu2 }
 0x1c5   :  { %v2422_v44 = vmax.f32 %v2414_v41, %v2421_v42 }
 0x1c7   :  { %v2424_v4 = vmax.f32 %v2420_v43, %v2422_v44 }
 0x1c8   :  { %v2383_v48 = vpop.f32.mrf.mxu3 }
 0x1c9   :  { %v2425_v5 = vmax.f32 %v2423_v47, %v2424_v4 }
 0x1cb   :  { %2426 = vmax.xlane.f32.xlu0 %v2425_v5 }
 0x23e   :  { %v2427_v49 = vpop.xlane.xlu0 %2426 }
 0x23f   :  { %v2428_v60 = vsub.f32 %v4247_v51, %v2427_v49  ;;  %v2429_v50 = vsub.f32 %v4255_v30, %v2427_v49  ;;  %v2430_v52 = vsub.f32 %v4263_v10, %v2427_v49  ;;  %v2431_v53 = vsub.f32 %v4270_v45, %v2427_v49 }
 0x240   :  { %v2432_v54 = vsub.f32 %v4272_v63, %v2427_v49  ;;  %v2433_v58 = vsub.f32 %v2278_v22, %v2427_v49  ;;  %v2434_v38 = vsub.f32 %v2330_v25, %v2427_v49  ;;  %v2435_v62 = vsub.f32 %v2410_v37, %v2427_v49 }
 0x241   :  { %v2436_v55 = vmul.f32 1.442695, %v2428_v60  ;;  %v2438_v56 = vmul.f32 1.442695, %v2429_v50  ;;  %v2440_v57 = vmul.f32 1.442695, %v2430_v52 }
 0x242   :  { %v2442_v59 = vmul.f32 1.442695, %v2431_v53  ;;  %v2444_v61 = vmul.f32 1.442695, %v2432_v54  ;;  %v2446_v51 = vmul.f32 1.442695, %v2433_v58 }
 0x243   :  { %3964 = vpow2.f32 %v2436_v55  ;;  %v2448_v30 = vmul.f32 1.442695, %v2434_v38  ;;  %v2450_v45 = vmul.f32 1.442695, %v2435_v62 }
 0x244   :  { %3966 = vpow2.f32 %v2438_v56 }
 0x245   :  { %3968 = vpow2.f32 %v2440_v57 }
 0x246   :  { %3970 = vpow2.f32 %v2442_v59 }
 0x247   :  { %3972 = vpow2.f32 %v2444_v61 }
 0x248   :  { %3974 = vpow2.f32 %v2446_v51 }
 0x249   :  { %v3965_v10 = vpop.eup %3964  ;;  %3976 = vpow2.f32 %v2448_v30 }
 0x24a   :  { %v3967_v0 = vpop.eup %3966  ;;  %v2452_v63 = vsel %vm1889_vm0, %v3965_v10, 0.0  ;;  %3978 = vpow2.f32 %v2450_v45 }
 0x24b   :  { %v3969_v1 = vpop.eup %3968  ;;  %v2453_v2 = vsel %vm1889_vm0, %v3967_v0, 0.0 }
 0x24c   :  { %v3971_v3 = vpop.eup %3970  ;;  %v2454_v6 = vadd.f32 %v2453_v2, %v2452_v63  ;;  %v2455_v7 = vsel %vm1889_vm0, %v3969_v1, 0.0 }
 0x24d   :  { %v3973_v8 = vpop.eup %3972  ;;  %v2457_v12 = vsel %vm1889_vm0, %v3971_v3, 0.0 }
 0x24e   :  { %v2456_v11 = vadd.f32 %v2455_v7, %v2454_v6  ;;  %v3975_v13 = vpop.eup %3974  ;;  %v2459_v15 = vsel %vm1889_vm0, %v3973_v8, 0.0 }
 0x24f   :  { %v3977_v16 = vpop.eup %3976  ;;  %v2461_v18 = vsel %vm1889_vm0, %v3975_v13, 0.0 }
 0x250   :  { %v2458_v14 = vadd.f32 %v2457_v12, %v2456_v11  ;;  %v3979_v19 = vpop.eup %3978  ;;  %v2463_v21 = vsel %vm1889_vm0, %v3977_v16, 0.0 }
 0x251   :  { %v2465_v23 = vsel %vm1889_vm0, %v3979_v19, 0.0 }
 0x252   :  { %v2460_v17 = vadd.f32 %v2459_v15, %v2458_v14 }
 0x254   :  { %v2462_v20 = vadd.f32 %v2461_v18, %v2460_v17 }
 0x256   :  { %v2464_v22 = vadd.f32 %v2463_v21, %v2462_v20 }
 0x258   :  { %v2466_v25 = vadd.f32 %v2465_v23, %v2464_v22 }
 0x25a   :  { %2467 = vadd.xlane.f32.xlu0 %v2466_v25 }
 0x2cd   :  { %v2468_v26 = vpop.xlane.xlu0 %2467 }
 0x2ce   :  { %3980 = vrcp.f32 %v2468_v26  ;;  %v2480_v24 = vand.u32 2147483648, %v2468_v26  ;;  %v2478_v32 = vand.u32 2147483647, %v2468_v26  ;;  %vm2474_vm4 = vweird.f32 %v2468_v26 }
 0x2d0   :  { %v2481_v34 = vor.u32 1.1754944e-38, %v2480_v24  ;;  %vm2479_vm6 = vcmp.eq.f32.partialorder %v2478_v32, 8.507059e+37 }
 0x2d4   :  { %v3981_v27 = vpop.eup %3980 }
 0x2d5   :  { %v2470_v28 = vmul.f32 %v3981_v27, %v2468_v26  ;;  %vm2475_vm3 = vweird.f32 %v3981_v27 }
 0x2d6   :  { %vm2476_vm5 = vmor %vm2474_vm4, %vm2475_vm3 }
 0x2d7   :  { %v2471_v29 = vsub.f32 1.0, %v2470_v28 }
 0x2d9   :  { %v2472_v31 = vmul.f32 %v3981_v27, %v2471_v29 }
 0x2db   :  { %v2473_v33 = vadd.f32 %v3981_v27, %v2472_v31 }
 0x2dd   :  { %v2477_v35 = vsel %vm2476_vm5, %v3981_v27, %v2473_v33 }
 0x2de   :  { %v2482_v36 = vsel %vm2479_vm6, %v2481_v34, %v2477_v35 }
 0x2df   :  { %v2484_v37 = vmul.f32 %v3967_v0, %v2482_v36  ;;  %v2485_v39 = vmul.f32 %v3969_v1, %v2482_v36  ;;  %v2486_v40 = vmul.f32 %v3971_v3, %v2482_v36  ;;  %v2488_v41 = vmul.f32 %v3975_v13, %v2482_v36 }
 0x2e0   :  { %v2489_v42 = vmul.f32 %v3977_v16, %v2482_v36  ;;  %v2490_v9 = vmul.f32 %v3979_v19, %v2482_v36  ;;  %v2483_v43 = vmul.f32 %v3965_v10, %v2482_v36  ;;  %v2487_v4 = vmul.f32 %v3973_v8, %v2482_v36 }
 0x2e1   :  { %v2499_v44 = vrot.slane %v2484_v37, 6  ;;  %v2500_v46 = vrot.slane %v2485_v39, 4  ;;  %v2501_v47 = vrot.slane %v2486_v40, 2  ;;  %v2502_v48 = vrot.slane %v2488_v41, 6 }
 0x2e2   :  { %v2503_v5 = vrot.slane %v2489_v42, 4  ;;  %v2504_v49 = vrot.slane %v2490_v9, 2 }
 0x2e3   :  { %v2505_v60 = vsel %vm1889_vm0, %v2483_v43, %v2499_v44  ;;  %v2507_v50 = vsel %vm2506_vm7, %v2500_v46, %v2501_v47  ;;  %v2510_v53 = vsel %vm1889_vm0, %v2487_v4, %v2502_v48 }
 0x2e4   :  { %v2509_v52 = vsel %vm2508_vm8, %v2505_v60, %v2507_v50  ;;  %v2511_v54 = vsel %vm2506_vm7, %v2503_v5, %v2504_v49 }
 0x2e5   :  { %v2512_v55 = vsel %vm2508_vm8, %v2510_v53, %v2511_v54  ;;  %2515 = vst [vmem:[#allocation11] sm:$0xff] %v2509_v52 }
 0x2e6   :  { %2516 = vst [vmem:[#allocation11 + $0x8] sm:$0xff] %v2512_v55 }
 0x2e7   :  { %2538 = dma.vmem_to_hbm [thread:$0]  %s2534_s16, 256, %s2536_s19, [#allocation12]  }
 0x2e8   :  { %4132 = dma.done.wait [#allocation4], 32  }
 0x2e9   :  { %4133 = vsyncadd [#allocation4], 4294967264 }
 0x2ea   :  { %4134 = dma.done.wait [#allocation12], 256  }
 0x2eb   :  { %4135 = vsyncadd [#allocation12], 4294967040 }
 0x2ec   :  { %2547 = vsyncpa [#allocation3], 1 }
 0x2ed   :  { %2548 = vsyncpa [#allocation6], 1 }
 0x2ee   :  { %2549 = vsyncpa [#allocation9], 1 }
 0x2ef   :  { %2550 = vsyncpa [#allocation4], 1 }
 0x2f0   :  { %2551 = vsyncpa [#allocation12], 1 }

</bundles_post_ra>
